<compile_context>
chip_gen: v7x
topology: tpu7x:2x2x1
jax: 0.10.0
libtpu: 0.0.40
codegen_flags: <defaults>
</compile_context>

<pallas_src>
import functools

import jax
import jax.numpy as jnp
from jax.experimental import pallas as pl
from jax.experimental.pallas import tpu as pltpu


def _layer_norm(h, gamma, beta, eps=1e-6):
    # The reference AddNorm passes eps=1e-06 to nn.LayerNorm (biased variance).
    mean = jnp.mean(h, axis=-1, keepdims=True)
    d = h - mean
    var = jnp.mean(d * d, axis=-1, keepdims=True)
    return d * jax.lax.rsqrt(var + eps) * gamma + beta


# ----------------------------- fused BERT kernel -----------------------------

def bert_kernel(x_ref, hmask_ref, pool_ref, wout_ref, bout_ref,
                wqkv_ref, bqkv_ref, wo_ref, bo_ref,
                g1_ref, be1_ref, w1_ref, b1_ref, w2_ref, b2_ref,
                g2_ref, be2_ref,
                o_ref, *, S, N, E, block_num):
    """Single invocation: all encoder blocks unrolled + mean-pool/Linear head.
    S = B (attention/seq axis), N = L (MHA batch axis)."""
    x = x_ref[...]                                   # (S*N, E) f32 activation
    hmask = hmask_ref[...]                           # (E, E) bf16 block-diag mask

    for b in range(block_num):                       # static unroll
        xb = x.astype(jnp.bfloat16)

        # --- fused Q|K|V projection (1/sqrt(head_dim) folded into Q columns) ---
        qkv = jnp.dot(xb, wqkv_ref[b],
                      preferred_element_type=jnp.float32) + bqkv_ref[b]  # (S*N,3E)
        q3 = qkv[:, 0:E].reshape(S, N, E)
        k3 = qkv[:, E:2 * E].reshape(S, N, E)
        v3 = qkv[:, 2 * E:3 * E].reshape(S, N, E)

        # --- attention over the S (= batch) axis ---
        # One bf16 matmul with a block-diagonal 0/1 mask computes, for every
        # lane e, the per-head score sum over that head's hd lanes, already
        # lane-replicated within the head (replaces the 2 tiny f32 indicator
        # matmuls of the previous version).
        qk = (q3[:, None, :, :] * k3[None, :, :, :]).astype(jnp.bfloat16)  # (S,S,N,E)
        scores = jnp.dot(qk.reshape(S * S * N, E), hmask,
                         preferred_element_type=jnp.float32
                         ).reshape(S, S, N, E)

        m = jnp.max(scores, axis=1, keepdims=True)
        e = jnp.exp(scores - m)
        denom = jnp.sum(e, axis=1, keepdims=True)
        p = e * pl.reciprocal(denom, approx=True)    # softmax over keys (axis t)
        # p is lane-replicated per head, so it weights V directly.
        ctx = jnp.sum(p * v3[None, :, :, :], axis=1).reshape(S * N, E)

        attn = jnp.dot(ctx.astype(jnp.bfloat16), wo_ref[b],
                       preferred_element_type=jnp.float32) + bo_ref[b]

        # --- Add & Norm 1 ---
        # TODO(synk): dropout layers are identity here (inference/eval semantics).
        y = _layer_norm(x + attn, g1_ref[b], be1_ref[b])

        # --- PositionWiseFFN ---
        f = jnp.maximum(
            jnp.dot(y.astype(jnp.bfloat16), w1_ref[b],
                    preferred_element_type=jnp.float32) + b1_ref[b], 0.0)
        f = jnp.dot(f.astype(jnp.bfloat16), w2_ref[b],
                    preferred_element_type=jnp.float32) + b2_ref[b]

        # --- Add & Norm 2 ---
        x = _layer_norm(y + f, g2_ref[b], be2_ref[b])

    # --- classification head: mean over L (tiny bf16 matmul) + Linear,
    #     lane-dense padded output ---
    pooled = jnp.dot(pool_ref[...], x.astype(jnp.bfloat16),
                     preferred_element_type=jnp.float32)                  # (B, E)
    o_ref[...] = jnp.dot(pooled.astype(jnp.bfloat16), wout_ref[...],
                         preferred_element_type=jnp.float32) + bout_ref[...]


# --------------------------------- wrapper -----------------------------------

def bert_forward(tokens, embedding, pos_emb, stacked, aux, out_w_pad, out_b_pad,
                 *, num_classes):
    B, L = tokens.shape
    E = embedding.shape[1]
    S, N = B, L
    block_num = stacked["wqkv"].shape[0]
    C_PAD = out_w_pad.shape[1]

    # Glue ops outside the kernel: embedding gather + position-embedding add.
    # TODO(synk): token-embedding gather stays a plain XLA gather (no Pallas win).
    x = jnp.take(embedding, tokens, axis=0) + pos_emb                     # (B, L, E)
    x2 = x.reshape(B * L, E).astype(jnp.float32)

    kern = functools.partial(bert_kernel, S=S, N=N, E=E, block_num=block_num)

    vmem = pl.BlockSpec(memory_space=pltpu.MemorySpace.VMEM)
    n_in = 17

    logits_pad = pl.pallas_call(
        kern,
        out_shape=jax.ShapeDtypeStruct((B, C_PAD), jnp.float32),
        in_specs=[vmem] * n_in,
        out_specs=vmem,
        compiler_params=pltpu.CompilerParams(vmem_limit_bytes=32 * 1024 * 1024),
    )(x2, aux["hmask"], aux["pool"], out_w_pad, out_b_pad,
      stacked["wqkv"], stacked["bqkv"], stacked["wo"], stacked["bo"],
      stacked["g1"], stacked["be1"], stacked["w1"], stacked["b1"],
      stacked["w2"], stacked["b2"], stacked["g2"], stacked["be2"])

    return logits_pad[:, :num_classes]


# ----------------------------- parameter helpers ------------------------------

def make_block_params(key, E, H, ffn_hidden):
    ks = jax.random.split(key, 6)
    s = 0.05
    hd = E // H
    scale = 1.0 / (hd ** 0.5)
    wq = jax.random.normal(ks[0], (E, E), jnp.float32) * s    # (in, out) layout
    wk = jax.random.normal(ks[1], (E, E), jnp.float32) * s
    wv = jax.random.normal(ks[2], (E, E), jnp.float32) * s
    wo = jax.random.normal(ks[3], (E, E), jnp.float32) * s
    bq = jnp.zeros((1, E), jnp.float32)
    bk = jnp.zeros((1, E), jnp.float32)
    bv = jnp.zeros((1, E), jnp.float32)
    # fused Q|K|V with the attention scale folded into the Q slice
    wqkv = jnp.concatenate([wq * scale, wk, wv], axis=1)      # (E, 3E)
    bqkv = jnp.concatenate([bq * scale, bk, bv], axis=1)      # (1, 3E)
    return dict(
        wqkv=wqkv, bqkv=bqkv, wo=wo, bo=jnp.zeros((1, E), jnp.float32),
        g1=jnp.ones((1, E), jnp.float32), be1=jnp.zeros((1, E), jnp.float32),
        w1=jax.random.normal(ks[4], (E, ffn_hidden), jnp.float32) * s,
        b1=jnp.zeros((1, ffn_hidden), jnp.float32),
        w2=jax.random.normal(ks[5], (ffn_hidden, E), jnp.float32) * s,
        b2=jnp.zeros((1, E), jnp.float32),
        g2=jnp.ones((1, E), jnp.float32), be2=jnp.zeros((1, E), jnp.float32),
    )


def stack_block_params(blocks):
    """Stack per-block params on a leading axis; matmul weights go to bf16."""
    bf16_keys = ("wqkv", "wo", "w1", "w2")
    out = {}
    for name in blocks[0]:
        a = jnp.stack([b[name] for b in blocks], axis=0)
        out[name] = a.astype(jnp.bfloat16) if name in bf16_keys else a
    return out


def make_aux(B, L, E, H):
    hd = E // H
    lane = jnp.arange(E)
    # block-diagonal head mask: hmask[e', e] = 1 iff e' and e are in the same head
    hmask = (lane[:, None] // hd == lane[None, :] // hd).astype(jnp.bfloat16)  # (E,E)
    rows = B * L
    pool = (((jnp.arange(rows)[None, :] // L) == jnp.arange(B)[:, None])
            .astype(jnp.float32) / L).astype(jnp.bfloat16)                     # (B,B*L)
    return dict(hmask=hmask, pool=pool)


# ------------------------------------ main ------------------------------------

if __name__ == "__main__":
    vocab_size = 50
    embed_dim = 32
    hidden_size = 64
    heads_num = 4
    block_num = 2
    max_len = 32       # L must equal max_len so pos-embedding broadcast matches PyTorch
    num_classes = 10
    C_PAD = 128        # lane-dense padded classifier width
    B, L = 2, max_len

    key = jax.random.PRNGKey(0)
    k_emb, k_pos, k_tok, k_out, *k_blocks = jax.random.split(key, 4 + block_num)

    embedding = jax.random.normal(k_emb, (vocab_size, embed_dim), jnp.float32) * 0.1
    pos_emb = jax.random.normal(k_pos, (1, max_len, embed_dim), jnp.float32) * 0.1
    tokens = jax.random.randint(k_tok, (B, L), 0, vocab_size, dtype=jnp.int32)

    blocks = [make_block_params(k_blocks[i], embed_dim, heads_num, hidden_size)
              for i in range(block_num)]
    stacked = stack_block_params(blocks)
    aux = make_aux(B, L, embed_dim, heads_num)

    out_w = jax.random.normal(k_out, (embed_dim, num_classes), jnp.float32) * 0.05
    out_b = jnp.zeros((1, num_classes), jnp.float32)
    out_w_pad = jnp.zeros((embed_dim, C_PAD), jnp.float32
                          ).at[:, :num_classes].set(out_w).astype(jnp.bfloat16)
    out_b_pad = jnp.zeros((1, C_PAD), jnp.float32).at[:, :num_classes].set(out_b)

    fwd = jax.jit(functools.partial(bert_forward, num_classes=num_classes))
    logits = fwd(tokens, embedding, pos_emb, stacked, aux, out_w_pad, out_b_pad)
    logits = jax.block_until_ready(logits)

    assert logits.shape == (B, num_classes)
    assert bool(jnp.all(jnp.isfinite(logits)))
    print("KERNEL_OK")
</pallas_src>

<mosaic_0001>
module attributes {stable_mosaic.version = 11 : i64} {
  func.func @bert_kernel(%arg0: memref<64x32xf32, #tpu.memory_space<vmem>>, %arg1: memref<32x32xbf16, #tpu.memory_space<vmem>>, %arg2: memref<2x64xbf16, #tpu.memory_space<vmem>>, %arg3: memref<32x128xbf16, #tpu.memory_space<vmem>>, %arg4: memref<1x128xf32, #tpu.memory_space<vmem>>, %arg5: memref<2x32x96xbf16, #tpu.memory_space<vmem>>, %arg6: memref<2x1x96xf32, #tpu.memory_space<vmem>>, %arg7: memref<2x32x32xbf16, #tpu.memory_space<vmem>>, %arg8: memref<2x1x32xf32, #tpu.memory_space<vmem>>, %arg9: memref<2x1x32xf32, #tpu.memory_space<vmem>>, %arg10: memref<2x1x32xf32, #tpu.memory_space<vmem>>, %arg11: memref<2x32x64xbf16, #tpu.memory_space<vmem>>, %arg12: memref<2x1x64xf32, #tpu.memory_space<vmem>>, %arg13: memref<2x64x32xbf16, #tpu.memory_space<vmem>>, %arg14: memref<2x1x32xf32, #tpu.memory_space<vmem>>, %arg15: memref<2x1x32xf32, #tpu.memory_space<vmem>>, %arg16: memref<2x1x32xf32, #tpu.memory_space<vmem>>, %arg17: memref<2x128xf32, #tpu.memory_space<vmem>>) attributes {dimension_semantics = [], scalar_prefetch = 0 : i64, scratch_operands = 0 : i64, tpu.core_type = #tpu.core_type<tc>} {
    %c0 = arith.constant 0 : index
    %c0_0 = arith.constant 0 : index
    %0 = vector.load %arg0[%c0, %c0_0] : memref<64x32xf32, #tpu.memory_space<vmem>>, vector<64x32xf32>
    %c0_1 = arith.constant 0 : index
    %c0_2 = arith.constant 0 : index
    %1 = vector.load %arg1[%c0_1, %c0_2] : memref<32x32xbf16, #tpu.memory_space<vmem>>, vector<32x32xbf16>
    %2 = arith.truncf %0 : vector<64x32xf32> to vector<64x32xbf16>
    %c0_3 = arith.constant 0 : index
    %c0_4 = arith.constant 0 : index
    %c0_5 = arith.constant 0 : index
    %3 = vector.load %arg5[%c0_3, %c0_4, %c0_5] : memref<2x32x96xbf16, #tpu.memory_space<vmem>>, vector<1x32x96xbf16>
    %4 = vector.shape_cast %3 : vector<1x32x96xbf16> to vector<32x96xbf16>
    %cst = arith.constant dense<0.000000e+00> : vector<64x96xf32>
    %5 = tpu.matmul %2, %4, %cst {dimension_numbers = #tpu.dot_dimension_numbers<[1], [0], [0], [1], [0, 0, 1, 1], [], []>} : vector<64x32xbf16>, vector<32x96xbf16>, vector<64x96xf32> -> vector<64x96xf32>
    %c0_6 = arith.constant 0 : index
    %c0_7 = arith.constant 0 : index
    %c0_8 = arith.constant 0 : index
    %6 = vector.load %arg6[%c0_6, %c0_7, %c0_8] : memref<2x1x96xf32, #tpu.memory_space<vmem>>, vector<1x1x96xf32>
    %7 = vector.shape_cast %6 : vector<1x1x96xf32> to vector<1x96xf32>
    %8 = vector.broadcast %7 : vector<1x96xf32> to vector<64x96xf32>
    %9 = arith.addf %5, %8 : vector<64x96xf32>
    %10 = vector.extract_strided_slice %9 {offsets = [0, 0], sizes = [64, 32], strides = [1, 1]} : vector<64x96xf32> to vector<64x32xf32>
    %11 = vector.shape_cast %10 : vector<64x32xf32> to vector<2x32x32xf32>
    %12 = vector.extract_strided_slice %9 {offsets = [0, 32], sizes = [64, 32], strides = [1, 1]} : vector<64x96xf32> to vector<64x32xf32>
    %13 = vector.shape_cast %12 : vector<64x32xf32> to vector<2x32x32xf32>
    %14 = vector.extract_strided_slice %9 {offsets = [0, 64], sizes = [64, 32], strides = [1, 1]} : vector<64x96xf32> to vector<64x32xf32>
    %15 = vector.shape_cast %14 : vector<64x32xf32> to vector<2x32x32xf32>
    %16 = vector.shape_cast %11 : vector<2x32x32xf32> to vector<2x1x32x32xf32>
    %17 = vector.shape_cast %13 : vector<2x32x32xf32> to vector<1x2x32x32xf32>
    %18 = vector.broadcast %16 : vector<2x1x32x32xf32> to vector<2x2x32x32xf32>
    %19 = vector.broadcast %17 : vector<1x2x32x32xf32> to vector<2x2x32x32xf32>
    %20 = arith.mulf %18, %19 : vector<2x2x32x32xf32>
    %21 = arith.truncf %20 : vector<2x2x32x32xf32> to vector<2x2x32x32xbf16>
    %22 = vector.shape_cast %21 : vector<2x2x32x32xbf16> to vector<128x32xbf16>
    %cst_9 = arith.constant dense<0.000000e+00> : vector<128x32xf32>
    %23 = tpu.matmul %22, %1, %cst_9 {dimension_numbers = #tpu.dot_dimension_numbers<[1], [0], [0], [1], [0, 0, 1, 1], [], []>} : vector<128x32xbf16>, vector<32x32xbf16>, vector<128x32xf32> -> vector<128x32xf32>
    %24 = vector.shape_cast %23 : vector<128x32xf32> to vector<2x2x32x32xf32>
    %cst_10 = arith.constant dense<0xFF800000> : vector<2x32x32xf32>
    %25 = vector.multi_reduction <maximumf>, %24, %cst_10 [1] : vector<2x2x32x32xf32> to vector<2x32x32xf32>
    %26 = vector.shape_cast %25 : vector<2x32x32xf32> to vector<2x1x32x32xf32>
    %27 = vector.broadcast %26 : vector<2x1x32x32xf32> to vector<2x2x32x32xf32>
    %28 = arith.subf %24, %27 : vector<2x2x32x32xf32>
    %29 = math.exp %28 : vector<2x2x32x32xf32>
    %cst_11 = arith.constant dense<0.000000e+00> : vector<2x32x32xf32>
    %30 = vector.multi_reduction <add>, %29, %cst_11 [1] : vector<2x2x32x32xf32> to vector<2x32x32xf32>
    %31 = vector.shape_cast %30 : vector<2x32x32xf32> to vector<2x1x32x32xf32>
    %32 = tpu.reciprocal %31 {approx = true} : vector<2x1x32x32xf32> -> vector<2x1x32x32xf32>
    %33 = vector.broadcast %32 : vector<2x1x32x32xf32> to vector<2x2x32x32xf32>
    %34 = arith.mulf %29, %33 : vector<2x2x32x32xf32>
    %35 = vector.shape_cast %15 : vector<2x32x32xf32> to vector<1x2x32x32xf32>
    %36 = vector.broadcast %35 : vector<1x2x32x32xf32> to vector<2x2x32x32xf32>
    %37 = arith.mulf %34, %36 : vector<2x2x32x32xf32>
    %cst_12 = arith.constant dense<0.000000e+00> : vector<2x32x32xf32>
    %38 = vector.multi_reduction <add>, %37, %cst_12 [1] : vector<2x2x32x32xf32> to vector<2x32x32xf32>
    %39 = vector.shape_cast %38 : vector<2x32x32xf32> to vector<64x32xf32>
    %40 = arith.truncf %39 : vector<64x32xf32> to vector<64x32xbf16>
    %c0_13 = arith.constant 0 : index
    %c0_14 = arith.constant 0 : index
    %c0_15 = arith.constant 0 : index
    %41 = vector.load %arg7[%c0_13, %c0_14, %c0_15] : memref<2x32x32xbf16, #tpu.memory_space<vmem>>, vector<1x32x32xbf16>
    %42 = vector.shape_cast %41 : vector<1x32x32xbf16> to vector<32x32xbf16>
    %cst_16 = arith.constant dense<0.000000e+00> : vector<64x32xf32>
    %43 = tpu.matmul %40, %42, %cst_16 {dimension_numbers = #tpu.dot_dimension_numbers<[1], [0], [0], [1], [0, 0, 1, 1], [], []>} : vector<64x32xbf16>, vector<32x32xbf16>, vector<64x32xf32> -> vector<64x32xf32>
    %c0_17 = arith.constant 0 : index
    %c0_18 = arith.constant 0 : index
    %c0_19 = arith.constant 0 : index
    %44 = vector.load %arg8[%c0_17, %c0_18, %c0_19] : memref<2x1x32xf32, #tpu.memory_space<vmem>>, vector<1x1x32xf32>
    %45 = vector.shape_cast %44 : vector<1x1x32xf32> to vector<1x32xf32>
    %46 = vector.broadcast %45 : vector<1x32xf32> to vector<64x32xf32>
    %47 = arith.addf %43, %46 : vector<64x32xf32>
    %48 = arith.addf %0, %47 : vector<64x32xf32>
    %c0_20 = arith.constant 0 : index
    %c0_21 = arith.constant 0 : index
    %c0_22 = arith.constant 0 : index
    %49 = vector.load %arg9[%c0_20, %c0_21, %c0_22] : memref<2x1x32xf32, #tpu.memory_space<vmem>>, vector<1x1x32xf32>
    %50 = vector.shape_cast %49 : vector<1x1x32xf32> to vector<1x32xf32>
    %c0_23 = arith.constant 0 : index
    %c0_24 = arith.constant 0 : index
    %c0_25 = arith.constant 0 : index
    %51 = vector.load %arg10[%c0_23, %c0_24, %c0_25] : memref<2x1x32xf32, #tpu.memory_space<vmem>>, vector<1x1x32xf32>
    %52 = vector.shape_cast %51 : vector<1x1x32xf32> to vector<1x32xf32>
    %cst_26 = arith.constant dense<0.000000e+00> : vector<64xf32>
    %53 = vector.multi_reduction <add>, %48, %cst_26 [1] : vector<64x32xf32> to vector<64xf32>
    %54 = vector.shape_cast %53 : vector<64xf32> to vector<64x1xf32>
    %cst_27 = arith.constant 3.200000e+01 : f32
    %55 = vector.broadcast %cst_27 : f32 to vector<64x1xf32>
    %56 = arith.divf %54, %55 : vector<64x1xf32>
    %57 = vector.broadcast %56 : vector<64x1xf32> to vector<64x32xf32>
    %58 = arith.subf %48, %57 : vector<64x32xf32>
    %59 = arith.mulf %58, %58 : vector<64x32xf32>
    %cst_28 = arith.constant dense<0.000000e+00> : vector<64xf32>
    %60 = vector.multi_reduction <add>, %59, %cst_28 [1] : vector<64x32xf32> to vector<64xf32>
    %61 = vector.shape_cast %60 : vector<64xf32> to vector<64x1xf32>
    %cst_29 = arith.constant 3.200000e+01 : f32
    %62 = vector.broadcast %cst_29 : f32 to vector<64x1xf32>
    %63 = arith.divf %61, %62 : vector<64x1xf32>
    %cst_30 = arith.constant 9.99999997E-7 : f32
    %64 = vector.broadcast %cst_30 : f32 to vector<64x1xf32>
    %65 = arith.addf %63, %64 : vector<64x1xf32>
    %66 = math.rsqrt %65 : vector<64x1xf32>
    %67 = vector.broadcast %66 : vector<64x1xf32> to vector<64x32xf32>
    %68 = arith.mulf %58, %67 : vector<64x32xf32>
    %69 = vector.broadcast %50 : vector<1x32xf32> to vector<64x32xf32>
    %70 = arith.mulf %68, %69 : vector<64x32xf32>
    %71 = vector.broadcast %52 : vector<1x32xf32> to vector<64x32xf32>
    %72 = arith.addf %70, %71 : vector<64x32xf32>
    %73 = arith.truncf %72 : vector<64x32xf32> to vector<64x32xbf16>
    %c0_31 = arith.constant 0 : index
    %c0_32 = arith.constant 0 : index
    %c0_33 = arith.constant 0 : index
    %74 = vector.load %arg11[%c0_31, %c0_32, %c0_33] : memref<2x32x64xbf16, #tpu.memory_space<vmem>>, vector<1x32x64xbf16>
    %75 = vector.shape_cast %74 : vector<1x32x64xbf16> to vector<32x64xbf16>
    %cst_34 = arith.constant dense<0.000000e+00> : vector<64x64xf32>
    %76 = tpu.matmul %73, %75, %cst_34 {dimension_numbers = #tpu.dot_dimension_numbers<[1], [0], [0], [1], [0, 0, 1, 1], [], []>} : vector<64x32xbf16>, vector<32x64xbf16>, vector<64x64xf32> -> vector<64x64xf32>
    %c0_35 = arith.constant 0 : index
    %c0_36 = arith.constant 0 : index
    %c0_37 = arith.constant 0 : index
    %77 = vector.load %arg12[%c0_35, %c0_36, %c0_37] : memref<2x1x64xf32, #tpu.memory_space<vmem>>, vector<1x1x64xf32>
    %78 = vector.shape_cast %77 : vector<1x1x64xf32> to vector<1x64xf32>
    %79 = vector.broadcast %78 : vector<1x64xf32> to vector<64x64xf32>
    %80 = arith.addf %76, %79 : vector<64x64xf32>
    %cst_38 = arith.constant 0.000000e+00 : f32
    %81 = vector.broadcast %cst_38 : f32 to vector<64x64xf32>
    %82 = arith.maximumf %80, %81 : vector<64x64xf32>
    %83 = arith.truncf %82 : vector<64x64xf32> to vector<64x64xbf16>
    %c0_39 = arith.constant 0 : index
    %c0_40 = arith.constant 0 : index
    %c0_41 = arith.constant 0 : index
    %84 = vector.load %arg13[%c0_39, %c0_40, %c0_41] : memref<2x64x32xbf16, #tpu.memory_space<vmem>>, vector<1x64x32xbf16>
    %85 = vector.shape_cast %84 : vector<1x64x32xbf16> to vector<64x32xbf16>
    %cst_42 = arith.constant dense<0.000000e+00> : vector<64x32xf32>
    %86 = tpu.matmul %83, %85, %cst_42 {dimension_numbers = #tpu.dot_dimension_numbers<[1], [0], [0], [1], [0, 0, 1, 1], [], []>} : vector<64x64xbf16>, vector<64x32xbf16>, vector<64x32xf32> -> vector<64x32xf32>
    %c0_43 = arith.constant 0 : index
    %c0_44 = arith.constant 0 : index
    %c0_45 = arith.constant 0 : index
    %87 = vector.load %arg14[%c0_43, %c0_44, %c0_45] : memref<2x1x32xf32, #tpu.memory_space<vmem>>, vector<1x1x32xf32>
    %88 = vector.shape_cast %87 : vector<1x1x32xf32> to vector<1x32xf32>
    %89 = vector.broadcast %88 : vector<1x32xf32> to vector<64x32xf32>
    %90 = arith.addf %86, %89 : vector<64x32xf32>
    %91 = arith.addf %72, %90 : vector<64x32xf32>
    %c0_46 = arith.constant 0 : index
    %c0_47 = arith.constant 0 : index
    %c0_48 = arith.constant 0 : index
    %92 = vector.load %arg15[%c0_46, %c0_47, %c0_48] : memref<2x1x32xf32, #tpu.memory_space<vmem>>, vector<1x1x32xf32>
    %93 = vector.shape_cast %92 : vector<1x1x32xf32> to vector<1x32xf32>
    %c0_49 = arith.constant 0 : index
    %c0_50 = arith.constant 0 : index
    %c0_51 = arith.constant 0 : index
    %94 = vector.load %arg16[%c0_49, %c0_50, %c0_51] : memref<2x1x32xf32, #tpu.memory_space<vmem>>, vector<1x1x32xf32>
    %95 = vector.shape_cast %94 : vector<1x1x32xf32> to vector<1x32xf32>
    %cst_52 = arith.constant dense<0.000000e+00> : vector<64xf32>
    %96 = vector.multi_reduction <add>, %91, %cst_52 [1] : vector<64x32xf32> to vector<64xf32>
    %97 = vector.shape_cast %96 : vector<64xf32> to vector<64x1xf32>
    %cst_53 = arith.constant 3.200000e+01 : f32
    %98 = vector.broadcast %cst_53 : f32 to vector<64x1xf32>
    %99 = arith.divf %97, %98 : vector<64x1xf32>
    %100 = vector.broadcast %99 : vector<64x1xf32> to vector<64x32xf32>
    %101 = arith.subf %91, %100 : vector<64x32xf32>
    %102 = arith.mulf %101, %101 : vector<64x32xf32>
    %cst_54 = arith.constant dense<0.000000e+00> : vector<64xf32>
    %103 = vector.multi_reduction <add>, %102, %cst_54 [1] : vector<64x32xf32> to vector<64xf32>
    %104 = vector.shape_cast %103 : vector<64xf32> to vector<64x1xf32>
    %cst_55 = arith.constant 3.200000e+01 : f32
    %105 = vector.broadcast %cst_55 : f32 to vector<64x1xf32>
    %106 = arith.divf %104, %105 : vector<64x1xf32>
    %cst_56 = arith.constant 9.99999997E-7 : f32
    %107 = vector.broadcast %cst_56 : f32 to vector<64x1xf32>
    %108 = arith.addf %106, %107 : vector<64x1xf32>
    %109 = math.rsqrt %108 : vector<64x1xf32>
    %110 = vector.broadcast %109 : vector<64x1xf32> to vector<64x32xf32>
    %111 = arith.mulf %101, %110 : vector<64x32xf32>
    %112 = vector.broadcast %93 : vector<1x32xf32> to vector<64x32xf32>
    %113 = arith.mulf %111, %112 : vector<64x32xf32>
    %114 = vector.broadcast %95 : vector<1x32xf32> to vector<64x32xf32>
    %115 = arith.addf %113, %114 : vector<64x32xf32>
    %116 = arith.truncf %115 : vector<64x32xf32> to vector<64x32xbf16>
    %c1 = arith.constant 1 : index
    %c0_57 = arith.constant 0 : index
    %c0_58 = arith.constant 0 : index
    %117 = vector.load %arg5[%c1, %c0_57, %c0_58] : memref<2x32x96xbf16, #tpu.memory_space<vmem>>, vector<1x32x96xbf16>
    %118 = vector.shape_cast %117 : vector<1x32x96xbf16> to vector<32x96xbf16>
    %cst_59 = arith.constant dense<0.000000e+00> : vector<64x96xf32>
    %119 = tpu.matmul %116, %118, %cst_59 {dimension_numbers = #tpu.dot_dimension_numbers<[1], [0], [0], [1], [0, 0, 1, 1], [], []>} : vector<64x32xbf16>, vector<32x96xbf16>, vector<64x96xf32> -> vector<64x96xf32>
    %c1_60 = arith.constant 1 : index
    %c0_61 = arith.constant 0 : index
    %c0_62 = arith.constant 0 : index
    %120 = vector.load %arg6[%c1_60, %c0_61, %c0_62] : memref<2x1x96xf32, #tpu.memory_space<vmem>>, vector<1x1x96xf32>
    %121 = vector.shape_cast %120 : vector<1x1x96xf32> to vector<1x96xf32>
    %122 = vector.broadcast %121 : vector<1x96xf32> to vector<64x96xf32>
    %123 = arith.addf %119, %122 : vector<64x96xf32>
    %124 = vector.extract_strided_slice %123 {offsets = [0, 0], sizes = [64, 32], strides = [1, 1]} : vector<64x96xf32> to vector<64x32xf32>
    %125 = vector.shape_cast %124 : vector<64x32xf32> to vector<2x32x32xf32>
    %126 = vector.extract_strided_slice %123 {offsets = [0, 32], sizes = [64, 32], strides = [1, 1]} : vector<64x96xf32> to vector<64x32xf32>
    %127 = vector.shape_cast %126 : vector<64x32xf32> to vector<2x32x32xf32>
    %128 = vector.extract_strided_slice %123 {offsets = [0, 64], sizes = [64, 32], strides = [1, 1]} : vector<64x96xf32> to vector<64x32xf32>
    %129 = vector.shape_cast %128 : vector<64x32xf32> to vector<2x32x32xf32>
    %130 = vector.shape_cast %125 : vector<2x32x32xf32> to vector<2x1x32x32xf32>
    %131 = vector.shape_cast %127 : vector<2x32x32xf32> to vector<1x2x32x32xf32>
    %132 = vector.broadcast %130 : vector<2x1x32x32xf32> to vector<2x2x32x32xf32>
    %133 = vector.broadcast %131 : vector<1x2x32x32xf32> to vector<2x2x32x32xf32>
    %134 = arith.mulf %132, %133 : vector<2x2x32x32xf32>
    %135 = arith.truncf %134 : vector<2x2x32x32xf32> to vector<2x2x32x32xbf16>
    %136 = vector.shape_cast %135 : vector<2x2x32x32xbf16> to vector<128x32xbf16>
    %cst_63 = arith.constant dense<0.000000e+00> : vector<128x32xf32>
    %137 = tpu.matmul %136, %1, %cst_63 {dimension_numbers = #tpu.dot_dimension_numbers<[1], [0], [0], [1], [0, 0, 1, 1], [], []>} : vector<128x32xbf16>, vector<32x32xbf16>, vector<128x32xf32> -> vector<128x32xf32>
    %138 = vector.shape_cast %137 : vector<128x32xf32> to vector<2x2x32x32xf32>
    %cst_64 = arith.constant dense<0xFF800000> : vector<2x32x32xf32>
    %139 = vector.multi_reduction <maximumf>, %138, %cst_64 [1] : vector<2x2x32x32xf32> to vector<2x32x32xf32>
    %140 = vector.shape_cast %139 : vector<2x32x32xf32> to vector<2x1x32x32xf32>
    %141 = vector.broadcast %140 : vector<2x1x32x32xf32> to vector<2x2x32x32xf32>
    %142 = arith.subf %138, %141 : vector<2x2x32x32xf32>
    %143 = math.exp %142 : vector<2x2x32x32xf32>
    %cst_65 = arith.constant dense<0.000000e+00> : vector<2x32x32xf32>
    %144 = vector.multi_reduction <add>, %143, %cst_65 [1] : vector<2x2x32x32xf32> to vector<2x32x32xf32>
    %145 = vector.shape_cast %144 : vector<2x32x32xf32> to vector<2x1x32x32xf32>
    %146 = tpu.reciprocal %145 {approx = true} : vector<2x1x32x32xf32> -> vector<2x1x32x32xf32>
    %147 = vector.broadcast %146 : vector<2x1x32x32xf32> to vector<2x2x32x32xf32>
    %148 = arith.mulf %143, %147 : vector<2x2x32x32xf32>
    %149 = vector.shape_cast %129 : vector<2x32x32xf32> to vector<1x2x32x32xf32>
    %150 = vector.broadcast %149 : vector<1x2x32x32xf32> to vector<2x2x32x32xf32>
    %151 = arith.mulf %148, %150 : vector<2x2x32x32xf32>
    %cst_66 = arith.constant dense<0.000000e+00> : vector<2x32x32xf32>
    %152 = vector.multi_reduction <add>, %151, %cst_66 [1] : vector<2x2x32x32xf32> to vector<2x32x32xf32>
    %153 = vector.shape_cast %152 : vector<2x32x32xf32> to vector<64x32xf32>
    %154 = arith.truncf %153 : vector<64x32xf32> to vector<64x32xbf16>
    %c1_67 = arith.constant 1 : index
    %c0_68 = arith.constant 0 : index
    %c0_69 = arith.constant 0 : index
    %155 = vector.load %arg7[%c1_67, %c0_68, %c0_69] : memref<2x32x32xbf16, #tpu.memory_space<vmem>>, vector<1x32x32xbf16>
    %156 = vector.shape_cast %155 : vector<1x32x32xbf16> to vector<32x32xbf16>
    %cst_70 = arith.constant dense<0.000000e+00> : vector<64x32xf32>
    %157 = tpu.matmul %154, %156, %cst_70 {dimension_numbers = #tpu.dot_dimension_numbers<[1], [0], [0], [1], [0, 0, 1, 1], [], []>} : vector<64x32xbf16>, vector<32x32xbf16>, vector<64x32xf32> -> vector<64x32xf32>
    %c1_71 = arith.constant 1 : index
    %c0_72 = arith.constant 0 : index
    %c0_73 = arith.constant 0 : index
    %158 = vector.load %arg8[%c1_71, %c0_72, %c0_73] : memref<2x1x32xf32, #tpu.memory_space<vmem>>, vector<1x1x32xf32>
    %159 = vector.shape_cast %158 : vector<1x1x32xf32> to vector<1x32xf32>
    %160 = vector.broadcast %159 : vector<1x32xf32> to vector<64x32xf32>
    %161 = arith.addf %157, %160 : vector<64x32xf32>
    %162 = arith.addf %115, %161 : vector<64x32xf32>
    %c1_74 = arith.constant 1 : index
    %c0_75 = arith.constant 0 : index
    %c0_76 = arith.constant 0 : index
    %163 = vector.load %arg9[%c1_74, %c0_75, %c0_76] : memref<2x1x32xf32, #tpu.memory_space<vmem>>, vector<1x1x32xf32>
    %164 = vector.shape_cast %163 : vector<1x1x32xf32> to vector<1x32xf32>
    %c1_77 = arith.constant 1 : index
    %c0_78 = arith.constant 0 : index
    %c0_79 = arith.constant 0 : index
    %165 = vector.load %arg10[%c1_77, %c0_78, %c0_79] : memref<2x1x32xf32, #tpu.memory_space<vmem>>, vector<1x1x32xf32>
    %166 = vector.shape_cast %165 : vector<1x1x32xf32> to vector<1x32xf32>
    %cst_80 = arith.constant dense<0.000000e+00> : vector<64xf32>
    %167 = vector.multi_reduction <add>, %162, %cst_80 [1] : vector<64x32xf32> to vector<64xf32>
    %168 = vector.shape_cast %167 : vector<64xf32> to vector<64x1xf32>
    %cst_81 = arith.constant 3.200000e+01 : f32
    %169 = vector.broadcast %cst_81 : f32 to vector<64x1xf32>
    %170 = arith.divf %168, %169 : vector<64x1xf32>
    %171 = vector.broadcast %170 : vector<64x1xf32> to vector<64x32xf32>
    %172 = arith.subf %162, %171 : vector<64x32xf32>
    %173 = arith.mulf %172, %172 : vector<64x32xf32>
    %cst_82 = arith.constant dense<0.000000e+00> : vector<64xf32>
    %174 = vector.multi_reduction <add>, %173, %cst_82 [1] : vector<64x32xf32> to vector<64xf32>
    %175 = vector.shape_cast %174 : vector<64xf32> to vector<64x1xf32>
    %cst_83 = arith.constant 3.200000e+01 : f32
    %176 = vector.broadcast %cst_83 : f32 to vector<64x1xf32>
    %177 = arith.divf %175, %176 : vector<64x1xf32>
    %cst_84 = arith.constant 9.99999997E-7 : f32
    %178 = vector.broadcast %cst_84 : f32 to vector<64x1xf32>
    %179 = arith.addf %177, %178 : vector<64x1xf32>
    %180 = math.rsqrt %179 : vector<64x1xf32>
    %181 = vector.broadcast %180 : vector<64x1xf32> to vector<64x32xf32>
    %182 = arith.mulf %172, %181 : vector<64x32xf32>
    %183 = vector.broadcast %164 : vector<1x32xf32> to vector<64x32xf32>
    %184 = arith.mulf %182, %183 : vector<64x32xf32>
    %185 = vector.broadcast %166 : vector<1x32xf32> to vector<64x32xf32>
    %186 = arith.addf %184, %185 : vector<64x32xf32>
    %187 = arith.truncf %186 : vector<64x32xf32> to vector<64x32xbf16>
    %c1_85 = arith.constant 1 : index
    %c0_86 = arith.constant 0 : index
    %c0_87 = arith.constant 0 : index
    %188 = vector.load %arg11[%c1_85, %c0_86, %c0_87] : memref<2x32x64xbf16, #tpu.memory_space<vmem>>, vector<1x32x64xbf16>
    %189 = vector.shape_cast %188 : vector<1x32x64xbf16> to vector<32x64xbf16>
    %cst_88 = arith.constant dense<0.000000e+00> : vector<64x64xf32>
    %190 = tpu.matmul %187, %189, %cst_88 {dimension_numbers = #tpu.dot_dimension_numbers<[1], [0], [0], [1], [0, 0, 1, 1], [], []>} : vector<64x32xbf16>, vector<32x64xbf16>, vector<64x64xf32> -> vector<64x64xf32>
    %c1_89 = arith.constant 1 : index
    %c0_90 = arith.constant 0 : index
    %c0_91 = arith.constant 0 : index
    %191 = vector.load %arg12[%c1_89, %c0_90, %c0_91] : memref<2x1x64xf32, #tpu.memory_space<vmem>>, vector<1x1x64xf32>
    %192 = vector.shape_cast %191 : vector<1x1x64xf32> to vector<1x64xf32>
    %193 = vector.broadcast %192 : vector<1x64xf32> to vector<64x64xf32>
    %194 = arith.addf %190, %193 : vector<64x64xf32>
    %cst_92 = arith.constant 0.000000e+00 : f32
    %195 = vector.broadcast %cst_92 : f32 to vector<64x64xf32>
    %196 = arith.maximumf %194, %195 : vector<64x64xf32>
    %197 = arith.truncf %196 : vector<64x64xf32> to vector<64x64xbf16>
    %c1_93 = arith.constant 1 : index
    %c0_94 = arith.constant 0 : index
    %c0_95 = arith.constant 0 : index
    %198 = vector.load %arg13[%c1_93, %c0_94, %c0_95] : memref<2x64x32xbf16, #tpu.memory_space<vmem>>, vector<1x64x32xbf16>
    %199 = vector.shape_cast %198 : vector<1x64x32xbf16> to vector<64x32xbf16>
    %cst_96 = arith.constant dense<0.000000e+00> : vector<64x32xf32>
    %200 = tpu.matmul %197, %199, %cst_96 {dimension_numbers = #tpu.dot_dimension_numbers<[1], [0], [0], [1], [0, 0, 1, 1], [], []>} : vector<64x64xbf16>, vector<64x32xbf16>, vector<64x32xf32> -> vector<64x32xf32>
    %c1_97 = arith.constant 1 : index
    %c0_98 = arith.constant 0 : index
    %c0_99 = arith.constant 0 : index
    %201 = vector.load %arg14[%c1_97, %c0_98, %c0_99] : memref<2x1x32xf32, #tpu.memory_space<vmem>>, vector<1x1x32xf32>
    %202 = vector.shape_cast %201 : vector<1x1x32xf32> to vector<1x32xf32>
    %203 = vector.broadcast %202 : vector<1x32xf32> to vector<64x32xf32>
    %204 = arith.addf %200, %203 : vector<64x32xf32>
    %205 = arith.addf %186, %204 : vector<64x32xf32>
    %c1_100 = arith.constant 1 : index
    %c0_101 = arith.constant 0 : index
    %c0_102 = arith.constant 0 : index
    %206 = vector.load %arg15[%c1_100, %c0_101, %c0_102] : memref<2x1x32xf32, #tpu.memory_space<vmem>>, vector<1x1x32xf32>
    %207 = vector.shape_cast %206 : vector<1x1x32xf32> to vector<1x32xf32>
    %c1_103 = arith.constant 1 : index
    %c0_104 = arith.constant 0 : index
    %c0_105 = arith.constant 0 : index
    %208 = vector.load %arg16[%c1_103, %c0_104, %c0_105] : memref<2x1x32xf32, #tpu.memory_space<vmem>>, vector<1x1x32xf32>
    %209 = vector.shape_cast %208 : vector<1x1x32xf32> to vector<1x32xf32>
    %cst_106 = arith.constant dense<0.000000e+00> : vector<64xf32>
    %210 = vector.multi_reduction <add>, %205, %cst_106 [1] : vector<64x32xf32> to vector<64xf32>
    %211 = vector.shape_cast %210 : vector<64xf32> to vector<64x1xf32>
    %cst_107 = arith.constant 3.200000e+01 : f32
    %212 = vector.broadcast %cst_107 : f32 to vector<64x1xf32>
    %213 = arith.divf %211, %212 : vector<64x1xf32>
    %214 = vector.broadcast %213 : vector<64x1xf32> to vector<64x32xf32>
    %215 = arith.subf %205, %214 : vector<64x32xf32>
    %216 = arith.mulf %215, %215 : vector<64x32xf32>
    %cst_108 = arith.constant dense<0.000000e+00> : vector<64xf32>
    %217 = vector.multi_reduction <add>, %216, %cst_108 [1] : vector<64x32xf32> to vector<64xf32>
    %218 = vector.shape_cast %217 : vector<64xf32> to vector<64x1xf32>
    %cst_109 = arith.constant 3.200000e+01 : f32
    %219 = vector.broadcast %cst_109 : f32 to vector<64x1xf32>
    %220 = arith.divf %218, %219 : vector<64x1xf32>
    %cst_110 = arith.constant 9.99999997E-7 : f32
    %221 = vector.broadcast %cst_110 : f32 to vector<64x1xf32>
    %222 = arith.addf %220, %221 : vector<64x1xf32>
    %223 = math.rsqrt %222 : vector<64x1xf32>
    %224 = vector.broadcast %223 : vector<64x1xf32> to vector<64x32xf32>
    %225 = arith.mulf %215, %224 : vector<64x32xf32>
    %226 = vector.broadcast %207 : vector<1x32xf32> to vector<64x32xf32>
    %227 = arith.mulf %225, %226 : vector<64x32xf32>
    %228 = vector.broadcast %209 : vector<1x32xf32> to vector<64x32xf32>
    %229 = arith.addf %227, %228 : vector<64x32xf32>
    %c0_111 = arith.constant 0 : index
    %c0_112 = arith.constant 0 : index
    %230 = vector.load %arg2[%c0_111, %c0_112] : memref<2x64xbf16, #tpu.memory_space<vmem>>, vector<2x64xbf16>
    %231 = arith.truncf %229 : vector<64x32xf32> to vector<64x32xbf16>
    %cst_113 = arith.constant dense<0.000000e+00> : vector<2x32xf32>
    %232 = tpu.matmul %230, %231, %cst_113 {dimension_numbers = #tpu.dot_dimension_numbers<[1], [0], [0], [1], [0, 0, 1, 1], [], []>} : vector<2x64xbf16>, vector<64x32xbf16>, vector<2x32xf32> -> vector<2x32xf32>
    %233 = arith.truncf %232 : vector<2x32xf32> to vector<2x32xbf16>
    %c0_114 = arith.constant 0 : index
    %c0_115 = arith.constant 0 : index
    %234 = vector.load %arg3[%c0_114, %c0_115] : memref<32x128xbf16, #tpu.memory_space<vmem>>, vector<32x128xbf16>
    %cst_116 = arith.constant dense<0.000000e+00> : vector<2x128xf32>
    %235 = tpu.matmul %233, %234, %cst_116 {dimension_numbers = #tpu.dot_dimension_numbers<[1], [0], [0], [1], [0, 0, 1, 1], [], []>} : vector<2x32xbf16>, vector<32x128xbf16>, vector<2x128xf32> -> vector<2x128xf32>
    %c0_117 = arith.constant 0 : index
    %c0_118 = arith.constant 0 : index
    %236 = vector.load %arg4[%c0_117, %c0_118] : memref<1x128xf32, #tpu.memory_space<vmem>>, vector<1x128xf32>
    %237 = vector.broadcast %236 : vector<1x128xf32> to vector<2x128xf32>
    %238 = arith.addf %235, %237 : vector<2x128xf32>
    %c0_119 = arith.constant 0 : index
    %c0_120 = arith.constant 0 : index
    %239 = vector.load %arg17[%c0_119, %c0_120] : memref<2x128xf32, #tpu.memory_space<vmem>>, vector<2x128xf32>
    tpu.vector_store %arg17[%c0_119, %c0_120], %238 {strides = array<i32>} : memref<2x128xf32, #tpu.memory_space<vmem>>, vector<2x128xf32>,
    return
  }
}

</mosaic_0001>

<bundles_post_ra>
// kernel: bert_forward.1
= control target key start
LH: loop header
LB: loop body
LE: loop exit
PB: predicated region body
PF: predicated region fallthrough
CT: control target
= control target key end

     0   :  { %s3868_s0 = inlined_call_operand.vmem [shape: f32[64,32], index: 0, kind: input, shape index: {}]   ;;  %s3869_s1 = inlined_call_operand.vmem [shape: bf16[32,32], index: 1, kind: input, shape index: {}]   ;;  %s3870_s2 = inlined_call_operand.vmem [shape: bf16[2,64], index: 2, kind: input, shape index: {}]   ;;  %s3871_s3 = inlined_call_operand.vmem [shape: bf16[32,128], index: 3, kind: input, shape index: {}]   ;;  %s3872_s4 = inlined_call_operand.vmem [shape: f32[1,128], index: 4, kind: input, shape index: {}]   ;;  %s3873_s5 = inlined_call_operand.vmem [shape: bf16[2,32,96], index: 5, kind: input, shape index: {}]   ;;  %s3874_s6 = inlined_call_operand.vmem [shape: f32[2,1,96], index: 6, kind: input, shape index: {}]   ;;  %s3875_s7 = inlined_call_operand.vmem [shape: bf16[2,32,32], index: 7, kind: input, shape index: {}]   ;;  %s3876_s8 = inlined_call_operand.vmem [shape: f32[2,1,32], index: 8, kind: input, shape index: {}]   ;;  %s3877_s9 = inlined_call_operand.vmem [shape: f32[2,1,32], index: 9, kind: input, shape index: {}]   ;;  %s3878_s10 = inlined_call_operand.vmem [shape: f32[2,1,32], index: 10, kind: input, shape index: {}]   ;;  %s3879_s11 = inlined_call_operand.vmem [shape: bf16[2,32,64], index: 11, kind: input, shape index: {}]   ;;  %s3880_s12 = inlined_call_operand.vmem [shape: f32[2,1,64], index: 12, kind: input, shape index: {}]   ;;  %s3881_s13 = inlined_call_operand.vmem [shape: bf16[2,64,32], index: 13, kind: input, shape index: {}]   ;;  %s3882_s14 = inlined_call_operand.vmem [shape: f32[2,1,32], index: 14, kind: input, shape index: {}]   ;;  %s3883_s15 = inlined_call_operand.vmem [shape: f32[2,1,32], index: 15, kind: input, shape index: {}]   ;;  %s3884_s16 = inlined_call_operand.vmem [shape: f32[2,1,32], index: 16, kind: input, shape index: {}]   ;;  %s3885_s17 = inlined_call_operand.hbm [shape: f32[2,128], index: 17, kind: output, shape index: {}]  }
   0x1   :  { %3888 = sst [smem:[#allocation5_spill]] %s3868_s0 }
   0x2   :  { %3889 = sst [smem:[#allocation6_spill]] %s3869_s1 }
   0x3   :  { %v2765_v0 = vld [vmem:[%s3873_s5] sm:$0xff]   ;;  %v2766_v1 = vld [vmem:[%s3873_s5 + $0x8] sm:$0xff]   ;;  %s3890_s0 = sld [smem:[#allocation5_spill]]  ;;  %vm97_vm0 = vcmask 261120  }
   0x4   :  { %2596 = vmatprep.subr.bf16.mxu0 %v2765_v0 }
   0x5   :  { %2597 = vmatpush3.bf16.msra.mxu0 %v2765_v0 }
   0x6   :  { %2598 = vmatprep.subr.bf16.mxu0 %v2766_v1 }
   0x9   :  { %v3077_v2 = vld [vmem:[%s3890_s0] sm:$0xff]  ;;  %v3082_v3 = vld [vmem:[%s3890_s0 + $0x8] sm:$0xff]  ;;  %v3089_v5 = vld [vmem:[%s3890_s0 + $0x10] sm:$0xff]  ;;  %2599 = vmatpush3.bf16.msra.mxu0 %v2766_v1 }
   0xa   :  { %v70_v4 = vpack.c.bf16 %v3082_v3, %v3077_v2  ;;  %v3094_v6 = vld [vmem:[%s3890_s0 + $0x18] sm:$0xff]  ;;  %v3099_v7 = vld [vmem:[%s3890_s0 + $0x20] sm:$0xff]  ;;  %v3104_v8 = vld [vmem:[%s3890_s0 + $0x28] sm:$0xff] }
   0xb   :  { %v71_v9 = vpack.c.bf16 %v3094_v6, %v3089_v5  ;;  %v72_v10 = vpack.c.bf16 %v3104_v8, %v3099_v7  ;;  %v3114_v11 = vld [vmem:[%s3890_s0 + $0x30] sm:$0xff]  ;;  %v3119_v12 = vld [vmem:[%s3890_s0 + $0x38] sm:$0xff] }
   0xc   :  { %2600 = vmatprep.mubr.msk.bf16.mxu0 %vm97_vm0, %v70_v4  ;;  %v73_v13 = vpack.c.bf16 %v3119_v12, %v3114_v11 }
   0xd   :  { %2601 = vmatmul.mubr.msk.bf16.vlgmr.msra.gmra.mrb[0].mxu0 %vm97_vm0, %v71_v9 }
   0xe   :  { %2604 = vmatprep.mubr.msk.bf16.mxu0 %vm97_vm0, %v72_v10 }
  0x15   :  { %2605 = vmatmul.mubr.msk.bf16.gmra.mrb[4].mxu0 %vm97_vm0, %v73_v13 }
  0x16   :  { %22 = vsyncpa [#allocation3], 0  ;;  %s3891_s19 = sld [smem:[#allocation6_spill]]  ;;  %v2397_v16 = vld [vmem:[%s3874_s6] ss:$0 sm:$0xff]  ;;  %s2973_s22 = smov 96  }
  0x17   :  { %s2974_s23 = smov 64   ;;  %v2769_v1 = vld [vmem:[%s3875_s7] sm:$0xff]   ;;  %v2770_v4 = vld [vmem:[%s3875_s7 + $0x8] sm:$0xff]   ;;  %vm950_vm1 = vcmask 523264   ;;  %vm2976_vm2 = vmmov 0   ;;  %s2977_s25 = smov [#allocation2]  }
  0x18   :  { %2628 = vmatprep.subr.bf16.mxu0 %v2769_v1  ;;  %s2389_s26 = sshll.u32 %s2977_s25, 4  ;;  %s2390_s26 = int_to_ptr.vmem [resolvable:$true] %s2389_s26 }
  0x19   :  { %2629 = vmatpush3.bf16.msra.mxu0 %v2769_v1  ;;  %p2954_p1 = scmp.lt.s32.totalorder %s2390_s26, %s2390_s26 }
  0x1a   :  { %2630 = vmatprep.subr.bf16.mxu0 %v2770_v4 }
  0x1c   :  { %v3129_v14 = vld [vmem:[%s3891_s19] sm:$0xff]   ;;  %v3136_v15 = vld [vmem:[%s3891_s19 + $0x8] sm:$0xff]  }
  0x1d   :  { %2608 = vmatprep.subr.bf16.mxu1 %v3129_v14  ;;  %2631 = vmatpush3.bf16.msra.mxu0 %v2770_v4 }
  0x1e   :  { %2609 = vmatpush3.bf16.msra.mxu1 %v3129_v14 }
  0x1f   :  { %2610 = vmatprep.subr.bf16.mxu1 %v3136_v15 }
  0x22   :  { %2611 = vmatpush3.bf16.msra.mxu1 %v3136_v15 }
  0xe0   :  { %v2602_v17 = vpop.f32.mrb[0].mxu0 }
  0xe1   :  { %v153_v18 = vadd.f32 %v2602_v17, %v2397_v16  ;;  %v144_v19 = vpop.f32.mrb[1].mxu0 }
  0xe2   :  { %v145_v20 = vadd.f32 %v2397_v16, %v144_v19  ;;  %v2603_v21 = vpop.f32.mrb[2].mxu0 }
  0xe3   :  { %187 = vrot.lane.b32.xlu1 %v153_v18, %s2973_s22  ;;  %v147_v22 = vpop.f32.mrb[3].mxu0  ;;  %v156_v23 = vadd.f32 %v2603_v21, %v2397_v16 }
  0xe4   :  { %183 = vrot.lane.b32.xlu0 %v145_v20, %s2973_s22  ;;  %v148_v24 = vadd.f32 %v2397_v16, %v147_v22 }
  0xe7   :  { %189 = vrot.lane.b32.xlu1 %v156_v23, %s2973_s22 }
  0xe8   :  { %v2606_v25 = vpop.f32.mrb[4].mxu0  ;;  %185 = vrot.lane.b32.xlu0 %v148_v24, %s2973_s22 }
  0xe9   :  { %v160_v26 = vpop.f32.mrb[5].mxu0  ;;  %v169_v31 = vadd.f32 %v2606_v25, %v2397_v16 }
  0xea   :  { %v161_v27 = vadd.f32 %v2397_v16, %v160_v26  ;;  %v2607_v28 = vpop.f32.mrb[6].mxu0 }
  0xeb   :  { %v163_v29 = vpop.f32.mrb[7].mxu0  ;;  %v172_v32 = vadd.f32 %v2607_v28, %v2397_v16 }
  0xec   :  { %v164_v30 = vadd.f32 %v2397_v16, %v163_v29  ;;  %191 = vrot.lane.b32.xlu0 %v161_v27, %s2973_s22 }
  0xee   :  { %193 = vrot.lane.b32.xlu1 %v164_v30, %s2973_s22 }
  0xf0   :  { %195 = vrot.lane.b32.xlu0 %v169_v31, %s2973_s22 }
  0xf2   :  { %197 = vrot.lane.b32.xlu1 %v172_v32, %s2973_s22 }
  0xf4   :  { %484 = vrot.lane.b32.xlu0 %v145_v20, %s2974_s23 }
  0xf6   :  { %486 = vrot.lane.b32.xlu1 %v148_v24, %s2974_s23 }
  0xf8   :  { %492 = vrot.lane.b32.xlu0 %v161_v27, %s2974_s23 }
  0xfa   :  { %490 = vrot.lane.b32.xlu1 %v156_v23, %s2974_s23 }
  0xfc   :  { %488 = vrot.lane.b32.xlu0 %v153_v18, %s2974_s23 }
  0xfe   :  { %494 = vrot.lane.b32.xlu1 %v164_v30, %s2974_s23 }
 0x100   :  { %496 = vrot.lane.b32.xlu0 %v169_v31, %s2974_s23 }
 0x102   :  { %498 = vrot.lane.b32.xlu1 %v172_v32, %s2974_s23 }
 0x155   :  { %v188_v33 = vpop.permute.xlu1 %187 }
 0x156   :  { %v184_v34 = vpop.permute.xlu0 %183  ;;  %v209_v40 = vmul.f32 %v188_v33, %v153_v18  ;;  %v217_v58 = vmul.f32 %v188_v33, %v169_v31 }
 0x157   :  { %v207_v38 = vmul.f32 %v184_v34, %v145_v20  ;;  %v215_v53 = vmul.f32 %v184_v34, %v161_v27 }
 0x159   :  { %v190_v35 = vpop.permute.xlu1 %189 }
 0x15a   :  { %v210_v36 = vmul.f32 %v190_v35, %v156_v23  ;;  %v186_v37 = vpop.permute.xlu0 %185  ;;  %v218_v56 = vmul.f32 %v190_v35, %v172_v32 }
 0x15b   :  { %v208_v39 = vmul.f32 %v186_v37, %v148_v24  ;;  %v216_v49 = vmul.f32 %v186_v37, %v164_v30 }
 0x15c   :  { %v224_v42 = vpack.c.bf16 %v210_v36, %v209_v40  ;;  %v228_v60 = vpack.c.bf16 %v218_v56, %v217_v58 }
 0x15d   :  { %v223_v41 = vpack.c.bf16 %v208_v39, %v207_v38  ;;  %v227_v55 = vpack.c.bf16 %v216_v49, %v215_v53 }
 0x15e   :  { %v192_v43 = vpop.permute.xlu0 %191 }
 0x15f   :  { %2612 = vmatprep.mubr.msk.bf16.mxu1 %vm97_vm0, %v223_v41  ;;  %v211_v45 = vmul.f32 %v192_v43, %v145_v20  ;;  %v219_v59 = vmul.f32 %v192_v43, %v161_v27 }
 0x160   :  { %v194_v44 = vpop.permute.xlu1 %193  ;;  %2613 = vmatmul.mubr.msk.bf16.vlgmr.msra.gmra.mrb[0].mxu1 %vm97_vm0, %v224_v42 }
 0x161   :  { %v212_v46 = vmul.f32 %v194_v44, %v148_v24  ;;  %v220_v57 = vmul.f32 %v194_v44, %v164_v30 }
 0x162   :  { %v196_v47 = vpop.permute.xlu0 %195 }
 0x163   :  { %v225_v48 = vpack.c.bf16 %v212_v46, %v211_v45  ;;  %v213_v51 = vmul.f32 %v196_v47, %v153_v18  ;;  %v229_v61 = vpack.c.bf16 %v220_v57, %v219_v59  ;;  %v221_v63 = vmul.f32 %v196_v47, %v169_v31 }
 0x164   :  { %v198_v50 = vpop.permute.xlu1 %197 }
 0x165   :  { %v214_v52 = vmul.f32 %v198_v50, %v156_v23  ;;  %2616 = vmatprep.mubr.msk.bf16.mxu1 %vm97_vm0, %v225_v48  ;;  %v222_v62 = vmul.f32 %v198_v50, %v172_v32 }
 0x167   :  { %v226_v54 = vpack.c.bf16 %v214_v52, %v213_v51  ;;  %v230_v0 = vpack.c.bf16 %v222_v62, %v221_v63 }
 0x169   :  { %2617 = vmatmul.mubr.msk.bf16.gmra.mrb[4].mxu1 %vm97_vm0, %v226_v54  ;;  %v3183_v54 = vpop.permute.xlu0 %484 }
 0x16a   :  { %2620 = vmatprep.mubr.msk.bf16.mxu1 %vm97_vm0, %v227_v55 }
 0x171   :  { %2621 = vmatmul.mubr.msk.bf16.gmra.mrb[8].mxu1 %vm97_vm0, %v228_v60 }
 0x172   :  { %2624 = vmatprep.mubr.msk.bf16.mxu1 %vm97_vm0, %v229_v61 }
 0x179   :  { %2625 = vmatmul.mubr.msk.bf16.gmra.mrb[12].mxu1 %vm97_vm0, %v230_v0 }
 0x233   :  { %v2614_v9 = vpop.f32.mrb[0].mxu1 }
 0x234   :  { %v301_v10 = vpop.f32.mrb[1].mxu1  ;;  %v370_v18 = vsel %vm97_vm0, %v2614_v9, -inf }
 0x235   :  { %v2615_v13 = vpop.f32.mrb[2].mxu1  ;;  %v364_v21 = vsel %vm97_vm0, %v301_v10, -inf }
 0x236   :  { %v304_v16 = vpop.f32.mrb[3].mxu1  ;;  %v373_v25 = vsel %vm97_vm0, %v2615_v13, -inf }
 0x237   :  { %v367_v26 = vsel %vm97_vm0, %v304_v16, -inf }
 0x23c   :  { %v2618_v17 = vpop.f32.mrb[4].mxu1 }
 0x23d   :  { %v371_v19 = vsel %vm97_vm0, %v2618_v17, -inf  ;;  %v317_v20 = vpop.f32.mrb[5].mxu1 }
 0x23e   :  { %v372_v22 = vmax.f32 %v370_v18, %v371_v19  ;;  %v365_v23 = vsel %vm97_vm0, %v317_v20, -inf  ;;  %v2619_v24 = vpop.f32.mrb[6].mxu1 }
 0x23f   :  { %v366_v27 = vmax.f32 %v364_v21, %v365_v23  ;;  %v374_v28 = vsel %vm97_vm0, %v2619_v24, -inf  ;;  %v320_v29 = vpop.f32.mrb[7].mxu1  ;;  %v3198_v21 = vpop.permute.xlu1 %486 }
 0x240   :  { %v390_v30 = vsub.f32 %v2614_v9, %v372_v22  ;;  %v394_v31 = vsub.f32 %v2618_v17, %v372_v22  ;;  %v375_v32 = vmax.f32 %v373_v25, %v374_v28  ;;  %v368_v33 = vsel %vm97_vm0, %v320_v29, -inf }
 0x241   :  { %v388_v34 = vsub.f32 %v301_v10, %v366_v27  ;;  %v392_v35 = vsub.f32 %v317_v20, %v366_v27  ;;  %v369_v36 = vmax.f32 %v367_v26, %v368_v33 }
 0x242   :  { %v408_v37 = vmul.f32 1.442695, %v390_v30  ;;  %v416_v38 = vmul.f32 1.442695, %v394_v31  ;;  %v391_v39 = vsub.f32 %v2615_v13, %v375_v32  ;;  %v395_v40 = vsub.f32 %v2619_v24, %v375_v32  ;;  %v3203_v32 = vpop.permute.xlu0 %492 }
 0x243   :  { %v404_v41 = vmul.f32 1.442695, %v388_v34  ;;  %v412_v42 = vmul.f32 1.442695, %v392_v35  ;;  %v389_v43 = vsub.f32 %v304_v16, %v369_v36  ;;  %v393_v44 = vsub.f32 %v320_v29, %v369_v36 }
 0x244   :  { %2789 = vpow2.f32 %v408_v37  ;;  %v410_v45 = vmul.f32 1.442695, %v391_v39  ;;  %v2622_v46 = vpop.f32.mrb[8].mxu1  ;;  %v418_v47 = vmul.f32 1.442695, %v395_v40 }
 0x245   :  { %2791 = vpow2.f32 %v416_v38  ;;  %v333_v48 = vpop.f32.mrb[9].mxu1  ;;  %v406_v49 = vmul.f32 1.442695, %v389_v43  ;;  %v414_v51 = vmul.f32 1.442695, %v393_v44  ;;  %v382_v55 = vsel %vm97_vm0, %v2622_v46, -inf }
 0x246   :  { %2793 = vpow2.f32 %v404_v41  ;;  %v2623_v50 = vpop.f32.mrb[10].mxu1  ;;  %v376_v59 = vsel %vm97_vm0, %v333_v48, -inf }
 0x247   :  { %2795 = vpow2.f32 %v412_v42  ;;  %v3181_v52 = vpop.f32.mrb[11].mxu1  ;;  %v385_v1 = vsel %vm97_vm0, %v2623_v50, -inf }
 0x248   :  { %2797 = vpow2.f32 %v410_v45  ;;  %v379_v42 = vsel %vm97_vm0, %v3181_v52, -inf }
 0x249   :  { %2799 = vpow2.f32 %v418_v47 }
 0x24a   :  { %2801 = vpow2.f32 %v406_v49 }
 0x24b   :  { %2803 = vpow2.f32 %v414_v51  ;;  %v3214_v51 = vpop.permute.xlu0 %488 }
 0x24c   :  { %v2626_v53 = vpop.f32.mrb[12].mxu1 }
 0x24d   :  { %v383_v56 = vsel %vm97_vm0, %v2626_v53, -inf  ;;  %v349_v57 = vpop.f32.mrb[13].mxu1 }
 0x24e   :  { %v3187_v58 = vpop.eup %2789  ;;  %v384_v60 = vmax.f32 %v382_v55, %v383_v56  ;;  %v377_v61 = vsel %vm97_vm0, %v349_v57, -inf  ;;  %v2627_v62 = vpop.f32.mrb[14].mxu1 }
 0x24f   :  { %v2792_v63 = vpop.eup %2791  ;;  %v442_v0 = vsel %vm97_vm0, %v3187_v58, 0.0  ;;  %v378_v4 = vmax.f32 %v376_v59, %v377_v61  ;;  %v386_v9 = vsel %vm97_vm0, %v2627_v62, -inf  ;;  %v352_v10 = vpop.f32.mrb[15].mxu1 }
 0x250   :  { %v3195_v13 = vpop.eup %2793  ;;  %v443_v16 = vsel %vm97_vm0, %v2792_v63, 0.0  ;;  %v398_v17 = vsub.f32 %v2622_v46, %v384_v60  ;;  %v402_v18 = vsub.f32 %v2626_v53, %v384_v60  ;;  %v387_v19 = vmax.f32 %v385_v1, %v386_v9  ;;  %v3212_v46 = vpop.permute.xlu1 %490 }
 0x251   :  { %v2796_v20 = vpop.eup %2795  ;;  %v444_v22 = vadd.f32 %v443_v16, %v442_v0  ;;  %v436_v23 = vsel %vm97_vm0, %v3195_v13, 0.0  ;;  %v396_v24 = vsub.f32 %v333_v48, %v378_v4  ;;  %v400_v25 = vsub.f32 %v349_v57, %v378_v4  ;;  %v497_v4 = vpop.permute.xlu0 %496 }
 0x252   :  { %v2798_v26 = vpop.eup %2797  ;;  %v437_v27 = vsel %vm97_vm0, %v2796_v20, 0.0  ;;  %v424_v28 = vmul.f32 1.442695, %v398_v17  ;;  %v432_v29 = vmul.f32 1.442695, %v402_v18  ;;  %v399_v30 = vsub.f32 %v2623_v50, %v387_v19 }
 0x253   :  { %v2800_v31 = vpop.eup %2799  ;;  %2805 = vrcp.f32 %v444_v22  ;;  %v438_v33 = vadd.f32 %v437_v27, %v436_v23  ;;  %v445_v34 = vsel %vm97_vm0, %v2798_v26, 0.0  ;;  %v420_v37 = vmul.f32 1.442695, %v396_v24 }
 0x254   :  { %v2802_v35 = vpop.eup %2801  ;;  %v446_v36 = vsel %vm97_vm0, %v2800_v31, 0.0  ;;  %2807 = vpow2.f32 %v424_v28  ;;  %v403_v38 = vsub.f32 %v2627_v62, %v387_v19  ;;  %v428_v44 = vmul.f32 1.442695, %v400_v25  ;;  %v3217_v60 = vpop.permute.xlu1 %494 }
 0x255   :  { %v2804_v39 = vpop.eup %2803  ;;  %2809 = vrcp.f32 %v438_v33  ;;  %v447_v40 = vadd.f32 %v446_v36, %v445_v34  ;;  %v439_v41 = vsel %vm97_vm0, %v2802_v35, 0.0  ;;  %v380_v45 = vsel %vm97_vm0, %v352_v10, -inf }
 0x256   :  { %v440_v43 = vsel %vm97_vm0, %v2804_v39, 0.0  ;;  %2811 = vpow2.f32 %v432_v29  ;;  %v426_v48 = vmul.f32 1.442695, %v399_v30  ;;  %v381_v49 = vmax.f32 %v379_v42, %v380_v45 }
 0x257   :  { %2813 = vrcp.f32 %v447_v40  ;;  %v441_v47 = vadd.f32 %v440_v43, %v439_v41  ;;  %v434_v50 = vmul.f32 1.442695, %v403_v38 }
 0x258   :  { %2815 = vpow2.f32 %v420_v37  ;;  %v397_v53 = vsub.f32 %v3181_v52, %v381_v49  ;;  %v401_v55 = vsub.f32 %v352_v10, %v381_v49  ;;  %v3229_v28 = vpop.permute.xlu1 %498 }
 0x259   :  { %2817 = vrcp.f32 %v441_v47 }
 0x25a   :  { %2819 = vpow2.f32 %v428_v44  ;;  %v422_v56 = vmul.f32 1.442695, %v397_v53  ;;  %v430_v57 = vmul.f32 1.442695, %v401_v55 }
 0x25b   :  { %2821 = vpow2.f32 %v426_v48 }
 0x25c   :  { %2823 = vpow2.f32 %v434_v50 }
 0x25d   :  { %v2806_v59 = vpop.eup %2805  ;;  %2825 = vpow2.f32 %v422_v56 }
 0x25e   :  { %v3219_v61 = vpop.eup %2807  ;;  %v470_v62 = vmul.f32 %v2806_v59, %v3187_v58  ;;  %v474_v0 = vmul.f32 %v2806_v59, %v2792_v63  ;;  %2827 = vpow2.f32 %v430_v57 }
 0x25f   :  { %v2810_v1 = vpop.eup %2809  ;;  %v454_v52 = vsel %vm97_vm0, %v3219_v61, 0.0 }
 0x260   :  { %v2812_v9 = vpop.eup %2811  ;;  %v510_v10 = vmul.f32 %v3214_v51, %v470_v62  ;;  %v514_v16 = vmul.f32 %v497_v4, %v474_v0  ;;  %v472_v17 = vmul.f32 %v2810_v1, %v2796_v20  ;;  %v468_v18 = vmul.f32 %v2810_v1, %v3195_v13 }
 0x261   :  { %v2814_v19 = vpop.eup %2813  ;;  %v455_v22 = vsel %vm97_vm0, %v2812_v9, 0.0 }
 0x262   :  { %v2816_v23 = vpop.eup %2815  ;;  %v530_v58 = vsel %vm97_vm0, %v510_v10, 0.0  ;;  %v531_v63 = vsel %vm97_vm0, %v514_v16, 0.0  ;;  %v471_v24 = vmul.f32 %v2814_v19, %v2798_v26  ;;  %v475_v25 = vmul.f32 %v2814_v19, %v2800_v31 }
 0x263   :  { %v2818_v27 = vpop.eup %2817  ;;  %v532_v29 = vadd.f32 %v531_v63, %v530_v58  ;;  %v456_v30 = vadd.f32 %v455_v22, %v454_v52  ;;  %v448_v33 = vsel %vm97_vm0, %v2816_v23, 0.0  ;;  %v508_v20 = vmul.f32 %v3183_v54, %v468_v18 }
 0x264   :  { %v2820_v13 = vpop.eup %2819  ;;  %v511_v34 = vmul.f32 %v3212_v46, %v471_v24  ;;  %v515_v36 = vmul.f32 %v3229_v28, %v475_v25  ;;  %v473_v37 = vmul.f32 %v2818_v27, %v2804_v39  ;;  %v469_v38 = vmul.f32 %v2818_v27, %v2802_v35 }
 0x265   :  { %v2822_v40 = vpop.eup %2821  ;;  %2829 = vrcp.f32 %v456_v30  ;;  %v449_v26 = vsel %vm97_vm0, %v2820_v13, 0.0  ;;  %v512_v31 = vmul.f32 %v3203_v32, %v472_v17  ;;  %v524_v41 = vsel %vm97_vm0, %v508_v20, 0.0 }
 0x266   :  { %v2824_v42 = vpop.eup %2823  ;;  %v533_v43 = vsel %vm97_vm0, %v511_v34, 0.0  ;;  %v534_v44 = vsel %vm97_vm0, %v515_v36, 0.0  ;;  %v450_v45 = vadd.f32 %v449_v26, %v448_v33  ;;  %v457_v47 = vsel %vm97_vm0, %v2822_v40, 0.0 }
 0x267   :  { %v2826_v48 = vpop.eup %2825  ;;  %v535_v49 = vadd.f32 %v534_v44, %v533_v43  ;;  %v458_v35 = vsel %vm97_vm0, %v2824_v42, 0.0  ;;  %v509_v39 = vmul.f32 %v3198_v21, %v469_v38  ;;  %v513_v50 = vmul.f32 %v3217_v60, %v473_v37 }
 0x268   :  { %v2828_v53 = vpop.eup %2827  ;;  %2831 = vrcp.f32 %v450_v45  ;;  %v459_v55 = vadd.f32 %v458_v35, %v457_v47  ;;  %v451_v56 = vsel %vm97_vm0, %v2826_v48, 0.0  ;;  %v525_v57 = vsel %vm97_vm0, %v512_v31, 0.0 }
 0x269   :  { %v452_v59 = vsel %vm97_vm0, %v2828_v53, 0.0  ;;  %v526_v62 = vadd.f32 %v525_v57, %v524_v41  ;;  %v527_v0 = vsel %vm97_vm0, %v509_v39, 0.0  ;;  %v528_v1 = vsel %vm97_vm0, %v513_v50, 0.0 }
 0x26a   :  { %2833 = vrcp.f32 %v459_v55  ;;  %v453_v52 = vadd.f32 %v452_v59, %v451_v56  ;;  %v529_v10 = vadd.f32 %v528_v1, %v527_v0  ;;  %v549_v16 = vpack.c.bf16 %v535_v49, %v532_v29 }
 0x26c   :  { %2835 = vrcp.f32 %v453_v52  ;;  %v548_v17 = vpack.c.bf16 %v529_v10, %v526_v62 }
 0x26e   :  { %2632 = vmatprep.mubr.msk.bf16.mxu0 %vm97_vm0, %v548_v17 }
 0x26f   :  { %v2830_v18 = vpop.eup %2829  ;;  %2633 = vmatmul.mubr.msk.bf16.vlgmr.msra.gmra.mrb[8].mxu0 %vm97_vm0, %v549_v16 }
 0x270   :  { %v482_v19 = vmul.f32 %v2830_v18, %v2812_v9  ;;  %v478_v22 = vmul.f32 %v2830_v18, %v3219_v61 }
 0x272   :  { %v2832_v58 = vpop.eup %2831  ;;  %v518_v63 = vmul.f32 %v3214_v51, %v478_v22  ;;  %v522_v24 = vmul.f32 %v497_v4, %v482_v19 }
 0x273   :  { %v480_v25 = vmul.f32 %v2832_v58, %v2820_v13  ;;  %v476_v27 = vmul.f32 %v2832_v58, %v2816_v23 }
 0x274   :  { %v2834_v30 = vpop.eup %2833  ;;  %v542_v33 = vsel %vm97_vm0, %v518_v63, 0.0  ;;  %v543_v29 = vsel %vm97_vm0, %v522_v24, 0.0 }
 0x275   :  { %v483_v20 = vmul.f32 %v2834_v30, %v2824_v42  ;;  %v516_v34 = vmul.f32 %v3183_v54, %v476_v27  ;;  %v520_v36 = vmul.f32 %v3203_v32, %v480_v25  ;;  %v479_v37 = vmul.f32 %v2834_v30, %v2822_v40 }
 0x276   :  { %v2836_v9 = vpop.eup %2835  ;;  %v544_v38 = vadd.f32 %v543_v29, %v542_v33 }
 0x277   :  { %v481_v61 = vmul.f32 %v2836_v9, %v2828_v53  ;;  %v477_v26 = vmul.f32 %v2836_v9, %v2826_v48  ;;  %v536_v51 = vsel %vm97_vm0, %v516_v34, 0.0  ;;  %v537_v4 = vsel %vm97_vm0, %v520_v36, 0.0 }
 0x278   :  { %v538_v23 = vadd.f32 %v537_v4, %v536_v51  ;;  %v519_v13 = vmul.f32 %v3212_v46, %v479_v37  ;;  %v523_v31 = vmul.f32 %v3229_v28, %v483_v20 }
 0x279   :  { %v517_v41 = vmul.f32 %v3198_v21, %v477_v26  ;;  %v521_v54 = vmul.f32 %v3217_v60, %v481_v61  ;;  %v2414_v21 = vld [vmem:[%s3876_s8] ss:$0 sm:$0xff] }
 0x27a   :  { %v545_v32 = vsel %vm97_vm0, %v519_v13, 0.0  ;;  %v546_v40 = vsel %vm97_vm0, %v523_v31, 0.0 }
 0x27b   :  { %v539_v42 = vsel %vm97_vm0, %v517_v41, 0.0  ;;  %v540_v43 = vsel %vm97_vm0, %v521_v54, 0.0  ;;  %v547_v44 = vadd.f32 %v546_v40, %v545_v32 }
 0x27c   :  { %v541_v45 = vadd.f32 %v540_v43, %v539_v42 }
 0x27d   :  { %v551_v47 = vpack.c.bf16 %v547_v44, %v544_v38 }
 0x27e   :  { %v550_v48 = vpack.c.bf16 %v541_v45, %v538_v23 }
 0x280   :  { %2636 = vmatprep.mubr.msk.bf16.mxu0 %vm97_vm0, %v550_v48 }
 0x281   :  { %2637 = vmatmul.mubr.msk.bf16.gmra.mrb[12].mxu0 %vm97_vm0, %v551_v47 }
 0x342   :  { %v2634_v46 = vpop.f32.mrb[8].mxu0 }
 0x343   :  { %v621_v60 = vpop.f32.mrb[9].mxu0  ;;  %v630_v28 = vadd.f32 %v2634_v46, %v2414_v21 }
 0x344   :  { %v622_v49 = vadd.f32 %v2414_v21, %v621_v60  ;;  %v2635_v35 = vpop.f32.mrb[10].mxu0 }
 0x345   :  { %v624_v39 = vpop.f32.mrb[11].mxu0  ;;  %v633_v55 = vadd.f32 %v2635_v35, %v2414_v21  ;;  %v654_v59 = vadd.f32 %v630_v28, %v3089_v5 }
 0x346   :  { %v625_v50 = vadd.f32 %v2414_v21, %v624_v39  ;;  %v652_v53 = vadd.f32 %v622_v49, %v3077_v2 }
 0x347   :  { %v668_v0 = vsel %vm97_vm0, %v654_v59, 0.0  ;;  %v655_v1 = vadd.f32 %v633_v55, %v3094_v6 }
 0x348   :  { %v662_v56 = vsel %vm97_vm0, %v652_v53, 0.0  ;;  %v653_v57 = vadd.f32 %v625_v50, %v3082_v3 }
 0x349   :  { %663 = vadd.xlane.f32.xlu0 %v662_v56  ;;  %v671_v52 = vsel %vm97_vm0, %v655_v1, 0.0 }
 0x34a   :  { %v665_v62 = vsel %vm97_vm0, %v653_v57, 0.0 }
 0x34b   :  { %666 = vadd.xlane.f32.xlu1 %v665_v62  ;;  %v2773_v62 = vld [vmem:[%s3881_s13] sm:$0xff]  }
 0x34c   :  { %2652 = vmatprep.subr.bf16.mxu1 %v2773_v62 }
 0x34d   :  { %669 = vadd.xlane.f32.xlu0 %v668_v0  ;;  %v2774_v0 = vld [vmem:[%s3881_s13 + $0x8] sm:$0xff]   ;;  %2653 = vmatpush3.bf16.msra.mxu1 %v2773_v62 }
 0x34e   :  { %2654 = vmatprep.subr.bf16.mxu1 %v2774_v0 }
 0x351   :  { %672 = vadd.xlane.f32.xlu0 %v671_v52  ;;  %2655 = vmatpush3.bf16.msra.mxu1 %v2774_v0 }
 0x354   :  { %v2638_v2 = vpop.f32.mrb[12].mxu0 }
 0x355   :  { %v637_v10 = vpop.f32.mrb[13].mxu0  ;;  %v646_v16 = vadd.f32 %v2638_v2, %v2414_v21 }
 0x356   :  { %v638_v17 = vadd.f32 %v2414_v21, %v637_v10  ;;  %v2639_v18 = vpop.f32.mrb[14].mxu0 }
 0x357   :  { %v640_v3 = vpop.f32.mrb[15].mxu0  ;;  %v649_v19 = vadd.f32 %v2639_v18, %v2414_v21  ;;  %v658_v6 = vadd.f32 %v646_v16, %v3114_v11 }
 0x358   :  { %v641_v5 = vadd.f32 %v2414_v21, %v640_v3  ;;  %v656_v22 = vadd.f32 %v638_v17, %v3099_v7 }
 0x359   :  { %v659_v25 = vadd.f32 %v649_v19, %v3119_v12  ;;  %v680_v27 = vsel %vm97_vm0, %v658_v6, 0.0 }
 0x35a   :  { %v674_v58 = vsel %vm97_vm0, %v656_v22, 0.0  ;;  %v657_v63 = vadd.f32 %v641_v5, %v3104_v8 }
 0x35b   :  { %675 = vadd.xlane.f32.xlu1 %v674_v58  ;;  %v683_v30 = vsel %vm97_vm0, %v659_v25, 0.0 }
 0x35c   :  { %v677_v24 = vsel %vm97_vm0, %v657_v63, 0.0 }
 0x35d   :  { %678 = vadd.xlane.f32.xlu0 %v677_v24  ;;  %v2421_v24 = vld [vmem:[%s3877_s9] ss:$0 sm:$0xff] }
 0x35f   :  { %681 = vadd.xlane.f32.xlu1 %v680_v27 }
 0x361   :  { %684 = vadd.xlane.f32.xlu0 %v683_v30 }
 0x3d6   :  { %v664_v33 = vpop.xlane.xlu0 %663 }
 0x3d7   :  { %v687_v7 = vmul.f32 0.03125, %v664_v33 }
 0x3d8   :  { %v667_v29 = vpop.xlane.xlu1 %666 }
 0x3d9   :  { %v3288_v20 = vsub.f32 %v652_v53, %v687_v7  ;;  %v688_v8 = vmul.f32 0.03125, %v667_v29 }
 0x3da   :  { %v670_v34 = vpop.xlane.xlu0 %669 }
 0x3db   :  { %v3290_v11 = vsub.f32 %v653_v57, %v688_v8  ;;  %v689_v36 = vmul.f32 0.03125, %v670_v34  ;;  %v703_v12 = vmul.f32 %v3288_v20, %v3288_v20  ;;  %v2771_v57 = vld [vmem:[%s3879_s11] sm:$0xff]  }
 0x3dc   :  { %2640 = vmatprep.subr.bf16.mxu0 %v2771_v57  ;;  %v2422_v8 = vld [vmem:[%s3878_s10] ss:$0 sm:$0xff] }
 0x3dd   :  { %v3294_v37 = vsub.f32 %v654_v59, %v689_v36  ;;  %v711_v9 = vsel %vm97_vm0, %v703_v12, 0.0  ;;  %v704_v38 = vmul.f32 %v3290_v11, %v3290_v11  ;;  %2641 = vmatpush3.bf16.msra.mxu0 %v2771_v57  ;;  %v2772_v59 = vld [vmem:[%s3879_s11 + $0x8] sm:$0xff]  }
 0x3de   :  { %712 = vadd.xlane.f32.xlu1 %v711_v9  ;;  %v673_v61 = vpop.xlane.xlu0 %672  ;;  %2642 = vmatprep.subr.bf16.mxu0 %v2772_v59 }
 0x3df   :  { %v690_v26 = vmul.f32 0.03125, %v673_v61  ;;  %v714_v51 = vsel %vm97_vm0, %v704_v38, 0.0  ;;  %v705_v4 = vmul.f32 %v3294_v37, %v3294_v37 }
 0x3e0   :  { %715 = vadd.xlane.f32.xlu0 %v714_v51 }
 0x3e1   :  { %v3302_v23 = vsub.f32 %v655_v1, %v690_v26  ;;  %v717_v13 = vsel %vm97_vm0, %v705_v4, 0.0  ;;  %2643 = vmatpush3.bf16.msra.mxu0 %v2772_v59  ;;  %v2775_v1 = vld [vmem:[%s3881_s13 + $0x10] sm:$0xff]  }
 0x3e2   :  { %718 = vadd.xlane.f32.xlu1 %v717_v13  ;;  %2656 = vmatprep.subr.bf16.mxu1 %v2775_v1 }
 0x3e3   :  { %v706_v31 = vmul.f32 %v3302_v23, %v3302_v23  ;;  %2657 = vmatpush3.bf16.msra.mxu1 %v2775_v1 }
 0x3e5   :  { %v720_v41 = vsel %vm97_vm0, %v706_v31, 0.0 }
 0x3e6   :  { %721 = vadd.xlane.f32.xlu0 %v720_v41 }
 0x3e8   :  { %v676_v54 = vpop.xlane.xlu1 %675 }
 0x3e9   :  { %v691_v32 = vmul.f32 0.03125, %v676_v54 }
 0x3ea   :  { %v679_v40 = vpop.xlane.xlu0 %678 }
 0x3eb   :  { %v3308_v42 = vsub.f32 %v656_v22, %v691_v32  ;;  %v692_v43 = vmul.f32 0.03125, %v679_v40 }
 0x3ec   :  { %v682_v44 = vpop.xlane.xlu1 %681 }
 0x3ed   :  { %v3310_v45 = vsub.f32 %v657_v63, %v692_v43  ;;  %v693_v47 = vmul.f32 0.03125, %v682_v44  ;;  %v707_v48 = vmul.f32 %v3308_v42, %v3308_v42 }
 0x3ee   :  { %v685_v21 = vpop.xlane.xlu0 %684 }
 0x3ef   :  { %v3314_v46 = vsub.f32 %v658_v6, %v693_v47  ;;  %v694_v60 = vmul.f32 0.03125, %v685_v21  ;;  %v723_v28 = vsel %vm97_vm0, %v707_v48, 0.0  ;;  %v708_v49 = vmul.f32 %v3310_v45, %v3310_v45 }
 0x3f0   :  { %724 = vadd.xlane.f32.xlu1 %v723_v28 }
 0x3f1   :  { %v3319_v35 = vsub.f32 %v659_v25, %v694_v60  ;;  %v726_v39 = vsel %vm97_vm0, %v708_v49, 0.0  ;;  %v709_v50 = vmul.f32 %v3314_v46, %v3314_v46 }
 0x3f2   :  { %727 = vadd.xlane.f32.xlu0 %v726_v39 }
 0x3f3   :  { %v729_v53 = vsel %vm97_vm0, %v709_v50, 0.0  ;;  %v710_v55 = vmul.f32 %v3319_v35, %v3319_v35 }
 0x3f4   :  { %730 = vadd.xlane.f32.xlu1 %v729_v53 }
 0x3f5   :  { %v732_v56 = vsel %vm97_vm0, %v710_v55, 0.0 }
 0x3f6   :  { %733 = vadd.xlane.f32.xlu0 %v732_v56 }
 0x46b   :  { %v713_v52 = vpop.xlane.xlu1 %712 }
 0x46c   :  { %v735_v2 = vmul.f32 0.03125, %v713_v52 }
 0x46d   :  { %v716_v10 = vpop.xlane.xlu0 %715 }
 0x46e   :  { %v743_v16 = vadd.f32 1e-06, %v735_v2  ;;  %v736_v17 = vmul.f32 0.03125, %v716_v10  ;;  %v2423_v2 = vld [vmem:[%s3880_s12] ss:$0 sm:$0xff] }
 0x46f   :  { %v719_v18 = vpop.xlane.xlu1 %718 }
 0x470   :  { %2837 = vrsqrt.f32 %v743_v16  ;;  %v744_v3 = vadd.f32 1e-06, %v736_v17  ;;  %v737_v19 = vmul.f32 0.03125, %v719_v18 }
 0x472   :  { %2839 = vrsqrt.f32 %v744_v3  ;;  %v745_v5 = vadd.f32 1e-06, %v737_v19 }
 0x473   :  { %v722_v22 = vpop.xlane.xlu0 %721 }
 0x474   :  { %2841 = vrsqrt.f32 %v745_v5  ;;  %v738_v58 = vmul.f32 0.03125, %v722_v22 }
 0x476   :  { %v746_v63 = vadd.f32 1e-06, %v738_v58 }
 0x478   :  { %2843 = vrsqrt.f32 %v746_v63 }
 0x47a   :  { %v2838_v6 = vpop.eup %2837 }
 0x47b   :  { %v759_v25 = vmul.f32 %v2838_v6, %v3288_v20 }
 0x47c   :  { %v2840_v27 = vpop.eup %2839 }
 0x47d   :  { %v760_v30 = vmul.f32 %v2840_v27, %v3290_v11  ;;  %v725_v33 = vpop.xlane.xlu1 %724  ;;  %v773_v7 = vmul.f32 %v2421_v24, %v759_v25 }
 0x47e   :  { %v2842_v29 = vpop.eup %2841  ;;  %v739_v34 = vmul.f32 0.03125, %v725_v33 }
 0x47f   :  { %v761_v36 = vmul.f32 %v2842_v29, %v3294_v37  ;;  %v728_v12 = vpop.xlane.xlu0 %727  ;;  %v774_v9 = vmul.f32 %v2421_v24, %v760_v30  ;;  %v3352_v51 = vadd.f32 %v2422_v8, %v773_v7 }
 0x480   :  { %v747_v38 = vadd.f32 1e-06, %v739_v34  ;;  %v740_v61 = vmul.f32 0.03125, %v728_v12 }
 0x481   :  { %v731_v26 = vpop.xlane.xlu1 %730  ;;  %v3354_v20 = vadd.f32 %v2422_v8, %v774_v9  ;;  %v775_v31 = vmul.f32 %v2421_v24, %v761_v36 }
 0x482   :  { %v2844_v11 = vpop.eup %2843  ;;  %2845 = vrsqrt.f32 %v747_v38  ;;  %v748_v4 = vadd.f32 1e-06, %v740_v61  ;;  %v741_v13 = vmul.f32 0.03125, %v731_v26 }
 0x483   :  { %v762_v41 = vmul.f32 %v2844_v11, %v3302_v23  ;;  %v734_v54 = vpop.xlane.xlu0 %733  ;;  %v795_v37 = vpack.c.bf16 %v3354_v20, %v3352_v51  ;;  %v3360_v47 = vadd.f32 %v2422_v8, %v775_v31 }
 0x484   :  { %2847 = vrsqrt.f32 %v748_v4  ;;  %v749_v32 = vadd.f32 1e-06, %v741_v13  ;;  %v742_v40 = vmul.f32 0.03125, %v734_v54 }
 0x485   :  { %v776_v43 = vmul.f32 %v2421_v24, %v762_v41  ;;  %2644 = vmatprep.mubr.msk.bf16.mxu0 %vm97_vm0, %v795_v37 }
 0x486   :  { %2849 = vrsqrt.f32 %v749_v32  ;;  %v750_v44 = vadd.f32 1e-06, %v742_v40 }
 0x487   :  { %v3362_v48 = vadd.f32 %v2422_v8, %v776_v43 }
 0x488   :  { %2851 = vrsqrt.f32 %v750_v44 }
 0x489   :  { %v796_v23 = vpack.c.bf16 %v3362_v48, %v3360_v47 }
 0x48b   :  { %2645 = vmatmul.mubr.msk.bf16.vlgmr.msra.gmra.mrb[16].mxu0 %vm97_vm0, %v796_v23 }
 0x48c   :  { %v2846_v21 = vpop.eup %2845 }
 0x48d   :  { %v763_v60 = vmul.f32 %v2846_v21, %v3308_v42 }
 0x48e   :  { %v2848_v28 = vpop.eup %2847 }
 0x48f   :  { %v764_v49 = vmul.f32 %v2848_v28, %v3310_v45  ;;  %v777_v39 = vmul.f32 %v2421_v24, %v763_v60 }
 0x490   :  { %v2850_v50 = vpop.eup %2849 }
 0x491   :  { %v765_v53 = vmul.f32 %v2850_v50, %v3314_v46  ;;  %v778_v55 = vmul.f32 %v2421_v24, %v764_v49  ;;  %v3371_v59 = vadd.f32 %v2422_v8, %v777_v39 }
 0x492   :  { %v2852_v56 = vpop.eup %2851 }
 0x493   :  { %v766_v57 = vmul.f32 %v2852_v56, %v3319_v35  ;;  %v3373_v62 = vadd.f32 %v2422_v8, %v778_v55  ;;  %v779_v0 = vmul.f32 %v2421_v24, %v765_v53  ;;  %v2776_v35 = vld [vmem:[%s3881_s13 + $0x18] sm:$0xff]  }
 0x494   :  { %2658 = vmatprep.subr.bf16.mxu1 %v2776_v35 }
 0x495   :  { %v797_v1 = vpack.c.bf16 %v3373_v62, %v3371_v59  ;;  %v780_v42 = vmul.f32 %v2421_v24, %v766_v57  ;;  %v3378_v45 = vadd.f32 %v2422_v8, %v779_v0  ;;  %2659 = vmatpush3.bf16.msra.mxu1 %v2776_v35 }
 0x496   :  { %2680 = vmatprep.subr.bf16.mxu1 %v3129_v14 }
 0x497   :  { %2648 = vmatprep.mubr.msk.bf16.mxu0 %vm97_vm0, %v797_v1  ;;  %v3380_v52 = vadd.f32 %v2422_v8, %v780_v42 }
 0x499   :  { %v798_v46 = vpack.c.bf16 %v3380_v52, %v3378_v45 }
 0x49b   :  { %2649 = vmatmul.mubr.msk.bf16.gmra.mrb[20].mxu0 %vm97_vm0, %v798_v46 }
 0x55e   :  { %v2646_v10 = vpop.f32.mrb[16].mxu0 }
 0x55f   :  { %v877_v16 = vadd.f32 %v2646_v10, %v2423_v2  ;;  %v868_v17 = vpop.f32.mrb[17].mxu0 }
 0x560   :  { %v869_v18 = vadd.f32 %v2423_v2, %v868_v17  ;;  %v2647_v3 = vpop.f32.mrb[18].mxu0 }
 0x561   :  { %v880_v19 = vadd.f32 %v2647_v3, %v2423_v2  ;;  %v871_v5 = vpop.f32.mrb[19].mxu0  ;;  %v901_v58 = vmax.f32 %v877_v16, 0.0 }
 0x562   :  { %v872_v22 = vadd.f32 %v2423_v2, %v871_v5  ;;  %v899_v6 = vmax.f32 %v869_v18, 0.0 }
 0x563   :  { %v902_v63 = vmax.f32 %v880_v19, 0.0 }
 0x564   :  { %v900_v24 = vmax.f32 %v872_v22, 0.0 }
 0x565   :  { %v908_v25 = vpack.c.bf16 %v902_v63, %v901_v58 }
 0x566   :  { %v907_v27 = vpack.c.bf16 %v900_v24, %v899_v6 }
 0x568   :  { %2660 = vmatprep.mubr.msk.bf16.mxu1 %vm950_vm1, %v907_v27 }
 0x569   :  { %2661 = vmatmul.mubr.msk.bf16.vlgmr.msra.gmra.mrb[16].mxu1 %vm950_vm1, %v908_v25 }
 0x56a   :  { %2681 = vmatpush3.bf16.msra.mxu1 %v3129_v14  ;;  %v2430_v14 = vld [vmem:[%s3882_s14] ss:$0 sm:$0xff] }
 0x56b   :  { %2682 = vmatprep.subr.bf16.mxu1 %v3136_v15 }
 0x56e   :  { %v2650_v30 = vpop.f32.mrb[20].mxu0  ;;  %2683 = vmatpush3.bf16.msra.mxu1 %v3136_v15 }
 0x56f   :  { %v893_v33 = vadd.f32 %v2650_v30, %v2423_v2  ;;  %v884_v7 = vpop.f32.mrb[21].mxu0 }
 0x570   :  { %v885_v29 = vadd.f32 %v2423_v2, %v884_v7  ;;  %v2651_v8 = vpop.f32.mrb[22].mxu0 }
 0x571   :  { %v896_v34 = vadd.f32 %v2651_v8, %v2423_v2  ;;  %v887_v36 = vpop.f32.mrb[23].mxu0  ;;  %v905_v9 = vmax.f32 %v893_v33, 0.0 }
 0x572   :  { %v888_v12 = vadd.f32 %v2423_v2, %v887_v36  ;;  %v903_v61 = vmax.f32 %v885_v29, 0.0 }
 0x573   :  { %v906_v38 = vmax.f32 %v896_v34, 0.0 }
 0x574   :  { %v904_v26 = vmax.f32 %v888_v12, 0.0 }
 0x575   :  { %v910_v11 = vpack.c.bf16 %v906_v38, %v905_v9 }
 0x576   :  { %v909_v4 = vpack.c.bf16 %v904_v26, %v903_v61 }
 0x578   :  { %2664 = vmatprep.mubr.msk.bf16.mxu1 %vm950_vm1, %v909_v4 }
 0x579   :  { %2665 = vmatmul.mubr.msk.bf16.gmra.mrb[20].mxu1 %vm950_vm1, %v910_v11 }
 0x63c   :  { %v2662_v15 = vpop.f32.mrb[16].mxu1 }
 0x63d   :  { %v997_v13 = vpop.f32.mrb[17].mxu1  ;;  %v1006_v31 = vadd.f32 %v2662_v15, %v2430_v14 }
 0x63e   :  { %v998_v41 = vadd.f32 %v2430_v14, %v997_v13  ;;  %v2663_v54 = vpop.f32.mrb[18].mxu1 }
 0x63f   :  { %v1000_v37 = vpop.f32.mrb[19].mxu1  ;;  %v1009_v32 = vadd.f32 %v2663_v54, %v2430_v14  ;;  %v1030_v21 = vadd.f32 %v1006_v31, %v3360_v47 }
 0x640   :  { %v1001_v40 = vadd.f32 %v2430_v14, %v1000_v37  ;;  %v1028_v43 = vadd.f32 %v998_v41, %v3352_v51 }
 0x641   :  { %v1031_v28 = vadd.f32 %v1009_v32, %v3362_v48  ;;  %v1044_v49 = vsel %vm97_vm0, %v1030_v21, 0.0 }
 0x642   :  { %v1038_v44 = vsel %vm97_vm0, %v1028_v43, 0.0  ;;  %v1029_v23 = vadd.f32 %v1001_v40, %v3354_v20 }
 0x643   :  { %1039 = vadd.xlane.f32.xlu1 %v1038_v44  ;;  %v1047_v39 = vsel %vm97_vm0, %v1031_v28, 0.0  ;;  %v2778_v44 = vld [vmem:[%s3873_s5 + $0x18] sm:$0xff]  }
 0x644   :  { %v1041_v60 = vsel %vm97_vm0, %v1029_v23, 0.0 }
 0x645   :  { %1042 = vadd.xlane.f32.xlu0 %v1041_v60 }
 0x647   :  { %1045 = vadd.xlane.f32.xlu1 %v1044_v49 }
 0x649   :  { %1048 = vadd.xlane.f32.xlu0 %v1047_v39 }
 0x64c   :  { %v2666_v50 = vpop.f32.mrb[20].mxu1 }
 0x64d   :  { %v1013_v51 = vpop.f32.mrb[21].mxu1  ;;  %v1022_v53 = vadd.f32 %v2666_v50, %v2430_v14 }
 0x64e   :  { %v1014_v55 = vadd.f32 %v2430_v14, %v1013_v51  ;;  %v2667_v56 = vpop.f32.mrb[22].mxu1 }
 0x64f   :  { %v1016_v20 = vpop.f32.mrb[23].mxu1  ;;  %v1025_v57 = vadd.f32 %v2667_v56, %v2430_v14  ;;  %v1034_v42 = vadd.f32 %v1022_v53, %v3378_v45 }
 0x650   :  { %v1017_v47 = vadd.f32 %v2430_v14, %v1016_v20  ;;  %v1032_v0 = vadd.f32 %v1014_v55, %v3371_v59 }
 0x651   :  { %v1035_v35 = vadd.f32 %v1025_v57, %v3380_v52  ;;  %v1056_v2 = vsel %vm97_vm0, %v1034_v42, 0.0 }
 0x652   :  { %v1050_v1 = vsel %vm97_vm0, %v1032_v0, 0.0  ;;  %v1033_v48 = vadd.f32 %v1017_v47, %v3373_v62  ;;  %v2439_v47 = vld [vmem:[%s3883_s15] ss:$0 sm:$0xff] }
 0x653   :  { %1051 = vadd.xlane.f32.xlu1 %v1050_v1  ;;  %v1059_v10 = vsel %vm97_vm0, %v1035_v35, 0.0 }
 0x654   :  { %v1053_v46 = vsel %vm97_vm0, %v1033_v48, 0.0 }
 0x655   :  { %1054 = vadd.xlane.f32.xlu0 %v1053_v46 }
 0x657   :  { %1057 = vadd.xlane.f32.xlu1 %v1056_v2 }
 0x659   :  { %1060 = vadd.xlane.f32.xlu0 %v1059_v10 }
 0x6d0   :  { %v1040_v16 = vpop.xlane.xlu1 %1039 }
 0x6d1   :  { %v1062_v59 = vmul.f32 0.03125, %v1040_v16  ;;  %v2440_v16 = vld [vmem:[%s3884_s16] ss:$0 sm:$0xff] }
 0x6d2   :  { %v1043_v17 = vpop.xlane.xlu0 %1042 }
 0x6d3   :  { %v3418_v18 = vsub.f32 %v1028_v43, %v1062_v59  ;;  %v1063_v62 = vmul.f32 0.03125, %v1043_v17  ;;  %v2777_v43 = vld [vmem:[%s3873_s5 + $0x10] sm:$0xff]  }
 0x6d4   :  { %v1046_v3 = vpop.xlane.xlu1 %1045  ;;  %2668 = vmatprep.subr.bf16.mxu0 %v2777_v43 }
 0x6d5   :  { %v3420_v45 = vsub.f32 %v1029_v23, %v1063_v62  ;;  %v1064_v19 = vmul.f32 0.03125, %v1046_v3  ;;  %v1078_v52 = vmul.f32 %v3418_v18, %v3418_v18  ;;  %2669 = vmatpush3.bf16.msra.mxu0 %v2777_v43 }
 0x6d6   :  { %v1049_v5 = vpop.xlane.xlu0 %1048  ;;  %2670 = vmatprep.subr.bf16.mxu0 %v2778_v44 }
 0x6d7   :  { %v3424_v22 = vsub.f32 %v1030_v21, %v1064_v19  ;;  %v1065_v58 = vmul.f32 0.03125, %v1049_v5  ;;  %v1086_v63 = vsel %vm97_vm0, %v1078_v52, 0.0  ;;  %v1079_v6 = vmul.f32 %v3420_v45, %v3420_v45 }
 0x6d8   :  { %1087 = vadd.xlane.f32.xlu1 %v1086_v63 }
 0x6d9   :  { %v3429_v24 = vsub.f32 %v1031_v28, %v1065_v58  ;;  %v1089_v25 = vsel %vm97_vm0, %v1079_v6, 0.0  ;;  %v1080_v27 = vmul.f32 %v3424_v22, %v3424_v22  ;;  %2671 = vmatpush3.bf16.msra.mxu0 %v2778_v44 }
 0x6da   :  { %1090 = vadd.xlane.f32.xlu0 %v1089_v25 }
 0x6db   :  { %v1092_v30 = vsel %vm97_vm0, %v1080_v27, 0.0  ;;  %v1081_v33 = vmul.f32 %v3429_v24, %v3429_v24 }
 0x6dc   :  { %1093 = vadd.xlane.f32.xlu1 %v1092_v30 }
 0x6dd   :  { %v1095_v7 = vsel %vm97_vm0, %v1081_v33, 0.0 }
 0x6de   :  { %1096 = vadd.xlane.f32.xlu0 %v1095_v7 }
 0x6e0   :  { %v1052_v29 = vpop.xlane.xlu1 %1051 }
 0x6e1   :  { %v1066_v8 = vmul.f32 0.03125, %v1052_v29 }
 0x6e2   :  { %v1055_v34 = vpop.xlane.xlu0 %1054 }
 0x6e3   :  { %v3438_v36 = vsub.f32 %v1032_v0, %v1066_v8  ;;  %v1067_v12 = vmul.f32 0.03125, %v1055_v34 }
 0x6e4   :  { %v1058_v9 = vpop.xlane.xlu1 %1057 }
 0x6e5   :  { %v3440_v38 = vsub.f32 %v1033_v48, %v1067_v12  ;;  %v1068_v61 = vmul.f32 0.03125, %v1058_v9  ;;  %v1082_v26 = vmul.f32 %v3438_v36, %v3438_v36 }
 0x6e6   :  { %v1061_v11 = vpop.xlane.xlu0 %1060 }
 0x6e7   :  { %v3444_v4 = vsub.f32 %v1034_v42, %v1068_v61  ;;  %v1069_v14 = vmul.f32 0.03125, %v1061_v11  ;;  %v1098_v15 = vsel %vm97_vm0, %v1082_v26, 0.0  ;;  %v1083_v13 = vmul.f32 %v3440_v38, %v3440_v38 }
 0x6e8   :  { %1099 = vadd.xlane.f32.xlu1 %v1098_v15 }
 0x6e9   :  { %v3449_v31 = vsub.f32 %v1035_v35, %v1069_v14  ;;  %v1101_v41 = vsel %vm97_vm0, %v1083_v13, 0.0  ;;  %v1084_v54 = vmul.f32 %v3444_v4, %v3444_v4 }
 0x6ea   :  { %1102 = vadd.xlane.f32.xlu0 %v1101_v41 }
 0x6eb   :  { %v1104_v37 = vsel %vm97_vm0, %v1084_v54, 0.0  ;;  %v1085_v32 = vmul.f32 %v3449_v31, %v3449_v31 }
 0x6ec   :  { %1105 = vadd.xlane.f32.xlu1 %v1104_v37 }
 0x6ed   :  { %v1107_v40 = vsel %vm97_vm0, %v1085_v32, 0.0 }
 0x6ee   :  { %1108 = vadd.xlane.f32.xlu0 %v1107_v40 }
 0x765   :  { %v1088_v23 = vpop.xlane.xlu1 %1087 }
 0x766   :  { %v1110_v21 = vmul.f32 0.03125, %v1088_v23 }
 0x767   :  { %v1091_v60 = vpop.xlane.xlu0 %1090 }
 0x768   :  { %v1118_v28 = vadd.f32 1e-06, %v1110_v21  ;;  %v1111_v49 = vmul.f32 0.03125, %v1091_v60 }
 0x769   :  { %v1094_v39 = vpop.xlane.xlu1 %1093 }
 0x76a   :  { %2853 = vrsqrt.f32 %v1118_v28  ;;  %v1119_v50 = vadd.f32 1e-06, %v1111_v49  ;;  %v1112_v51 = vmul.f32 0.03125, %v1094_v39 }
 0x76b   :  { %v1097_v53 = vpop.xlane.xlu0 %1096 }
 0x76c   :  { %2855 = vrsqrt.f32 %v1119_v50  ;;  %v1120_v55 = vadd.f32 1e-06, %v1112_v51  ;;  %v1113_v56 = vmul.f32 0.03125, %v1097_v53 }
 0x76e   :  { %2857 = vrsqrt.f32 %v1120_v55  ;;  %v1121_v20 = vadd.f32 1e-06, %v1113_v56 }
 0x770   :  { %2859 = vrsqrt.f32 %v1121_v20 }
 0x774   :  { %v2854_v57 = vpop.eup %2853 }
 0x775   :  { %v1134_v0 = vmul.f32 %v2854_v57, %v3418_v18  ;;  %v1100_v1 = vpop.xlane.xlu1 %1099 }
 0x776   :  { %v2856_v48 = vpop.eup %2855  ;;  %v1114_v42 = vmul.f32 0.03125, %v1100_v1 }
 0x777   :  { %v1135_v46 = vmul.f32 %v2856_v48, %v3420_v45  ;;  %v1103_v35 = vpop.xlane.xlu0 %1102  ;;  %v1148_v2 = vmul.f32 %v2439_v47, %v1134_v0 }
 0x778   :  { %v2858_v10 = vpop.eup %2857  ;;  %v1122_v59 = vadd.f32 1e-06, %v1114_v42  ;;  %v1115_v17 = vmul.f32 0.03125, %v1103_v35 }
 0x779   :  { %v1136_v62 = vmul.f32 %v2858_v10, %v3424_v22  ;;  %v1106_v3 = vpop.xlane.xlu1 %1105  ;;  %v1149_v19 = vmul.f32 %v2439_v47, %v1135_v46  ;;  %v3474_v6 = vadd.f32 %v2440_v16, %v1148_v2 }
 0x77a   :  { %v2860_v52 = vpop.eup %2859  ;;  %2861 = vrsqrt.f32 %v1122_v59  ;;  %v1123_v18 = vadd.f32 1e-06, %v1115_v17  ;;  %v1116_v5 = vmul.f32 0.03125, %v1106_v3 }
 0x77b   :  { %v1150_v58 = vmul.f32 %v2439_v47, %v1136_v62  ;;  %v1137_v45 = vmul.f32 %v2860_v52, %v3429_v24  ;;  %v1109_v63 = vpop.xlane.xlu0 %1108  ;;  %v3476_v25 = vadd.f32 %v2440_v16, %v1149_v19 }
 0x77c   :  { %2863 = vrsqrt.f32 %v1123_v18  ;;  %v1124_v27 = vadd.f32 1e-06, %v1116_v5  ;;  %v1117_v30 = vmul.f32 0.03125, %v1109_v63 }
 0x77d   :  { %v1151_v33 = vmul.f32 %v2439_v47, %v1137_v45  ;;  %v1170_v22 = vpack.c.bf16 %v3476_v25, %v3474_v6  ;;  %v3480_v29 = vadd.f32 %v2440_v16, %v1150_v58 }
 0x77e   :  { %2865 = vrsqrt.f32 %v1124_v27  ;;  %v1125_v7 = vadd.f32 1e-06, %v1117_v30 }
 0x77f   :  { %v3482_v8 = vadd.f32 %v2440_v16, %v1151_v33  ;;  %2672 = vmatprep.mubr.msk.bf16.mxu0 %vm97_vm0, %v1170_v22 }
 0x780   :  { %2867 = vrsqrt.f32 %v1125_v7 }
 0x781   :  { %v1171_v24 = vpack.c.bf16 %v3482_v8, %v3480_v29 }
 0x783   :  { %2673 = vmatmul.mubr.msk.bf16.vlgmr.msra.gmra.mrb[24].mxu0 %vm97_vm0, %v1171_v24 }
 0x784   :  { %v2862_v34 = vpop.eup %2861 }
 0x785   :  { %v1138_v12 = vmul.f32 %v2862_v34, %v3438_v36 }
 0x786   :  { %v2864_v9 = vpop.eup %2863 }
 0x787   :  { %v1139_v61 = vmul.f32 %v2864_v9, %v3440_v38  ;;  %v1152_v26 = vmul.f32 %v2439_v47, %v1138_v12 }
 0x788   :  { %v2866_v11 = vpop.eup %2865 }
 0x789   :  { %v1140_v14 = vmul.f32 %v2866_v11, %v3444_v4  ;;  %v1153_v15 = vmul.f32 %v2439_v47, %v1139_v61  ;;  %v3492_v54 = vadd.f32 %v2440_v16, %v1152_v26 }
 0x78a   :  { %v2868_v13 = vpop.eup %2867 }
 0x78b   :  { %v1141_v41 = vmul.f32 %v2868_v13, %v3449_v31  ;;  %v3494_v37 = vadd.f32 %v2440_v16, %v1153_v15  ;;  %v1154_v32 = vmul.f32 %v2439_v47, %v1140_v14  ;;  %v2446_v31 = vld [vmem:[%s3874_s6 + $0x1] ss:$0 sm:$0xff]  ;;  %v2779_v15 = vld [vmem:[%s3875_s7 + $0x10] sm:$0xff]   ;;  %v2780_v13 = vld [vmem:[%s3875_s7 + $0x18] sm:$0xff]  }
 0x78c   :  { %2700 = vmatprep.subr.bf16.mxu0 %v2779_v15 }
 0x78d   :  { %v1172_v40 = vpack.c.bf16 %v3494_v37, %v3492_v54  ;;  %v1155_v36 = vmul.f32 %v2439_v47, %v1141_v41  ;;  %v3499_v38 = vadd.f32 %v2440_v16, %v1154_v32  ;;  %2701 = vmatpush3.bf16.msra.mxu0 %v2779_v15 }
 0x78e   :  { %2702 = vmatprep.subr.bf16.mxu0 %v2780_v13 }
 0x78f   :  { %2676 = vmatprep.mubr.msk.bf16.mxu0 %vm97_vm0, %v1172_v40  ;;  %v3501_v43 = vadd.f32 %v2440_v16, %v1155_v36 }
 0x791   :  { %v1173_v4 = vpack.c.bf16 %v3501_v43, %v3499_v38  ;;  %2703 = vmatpush3.bf16.msra.mxu0 %v2780_v13 }
 0x793   :  { %2677 = vmatmul.mubr.msk.bf16.gmra.mrb[28].mxu0 %vm97_vm0, %v1173_v4 }
 0x856   :  { %v2674_v44 = vpop.f32.mrb[24].mxu0 }
 0x857   :  { %v1245_v23 = vpop.f32.mrb[25].mxu0  ;;  %v1254_v39 = vadd.f32 %v2674_v44, %v2446_v31 }
 0x858   :  { %v1246_v21 = vadd.f32 %v2446_v31, %v1245_v23  ;;  %v2675_v60 = vpop.f32.mrb[26].mxu0 }
 0x859   :  { %v1248_v28 = vpop.f32.mrb[27].mxu0  ;;  %v1257_v50 = vadd.f32 %v2675_v60, %v2446_v31 }
 0x85a   :  { %v1249_v49 = vadd.f32 %v2446_v31, %v1248_v28  ;;  %1284 = vrot.lane.b32.xlu1 %v1246_v21, %s2973_s22 }
 0x85c   :  { %1286 = vrot.lane.b32.xlu0 %v1249_v49, %s2973_s22 }
 0x85e   :  { %1288 = vrot.lane.b32.xlu1 %v1254_v39, %s2973_s22 }
 0x862   :  { %1290 = vrot.lane.b32.xlu1 %v1257_v50, %s2973_s22 }
 0x866   :  { %v2678_v51 = vpop.f32.mrb[28].mxu0 }
 0x867   :  { %v1261_v53 = vpop.f32.mrb[29].mxu0  ;;  %v1270_v47 = vadd.f32 %v2678_v51, %v2446_v31 }
 0x868   :  { %v1262_v55 = vadd.f32 %v2446_v31, %v1261_v53  ;;  %v2679_v56 = vpop.f32.mrb[30].mxu0 }
 0x869   :  { %v1264_v20 = vpop.f32.mrb[31].mxu0  ;;  %v1273_v0 = vadd.f32 %v2679_v56, %v2446_v31 }
 0x86a   :  { %v1265_v57 = vadd.f32 %v2446_v31, %v1264_v20  ;;  %1292 = vrot.lane.b32.xlu0 %v1262_v55, %s2973_s22 }
 0x86c   :  { %1294 = vrot.lane.b32.xlu1 %v1265_v57, %s2973_s22 }
 0x86e   :  { %1296 = vrot.lane.b32.xlu0 %v1270_v47, %s2973_s22 }
 0x870   :  { %1298 = vrot.lane.b32.xlu1 %v1273_v0, %s2973_s22 }
 0x872   :  { %1573 = vrot.lane.b32.xlu0 %v1246_v21, %s2974_s23 }
 0x874   :  { %1575 = vrot.lane.b32.xlu1 %v1249_v49, %s2974_s23 }
 0x876   :  { %1581 = vrot.lane.b32.xlu0 %v1262_v55, %s2974_s23 }
 0x878   :  { %1579 = vrot.lane.b32.xlu1 %v1257_v50, %s2974_s23 }
 0x87a   :  { %1577 = vrot.lane.b32.xlu0 %v1254_v39, %s2974_s23 }
 0x87c   :  { %1583 = vrot.lane.b32.xlu1 %v1265_v57, %s2974_s23 }
 0x87e   :  { %1585 = vrot.lane.b32.xlu0 %v1270_v47, %s2974_s23 }
 0x880   :  { %1587 = vrot.lane.b32.xlu1 %v1273_v0, %s2974_s23 }
 0x8cc   :  { %v1285_v1 = vpop.permute.xlu1 %1284 }
 0x8cd   :  { %v1308_v42 = vmul.f32 %v1285_v1, %v1246_v21  ;;  %v1316_v30 = vmul.f32 %v1285_v1, %v1262_v55 }
 0x8ce   :  { %v1287_v48 = vpop.permute.xlu0 %1286 }
 0x8cf   :  { %v1309_v46 = vmul.f32 %v1287_v48, %v1249_v49  ;;  %v1317_v58 = vmul.f32 %v1287_v48, %v1265_v57 }
 0x8d0   :  { %v1289_v35 = vpop.permute.xlu1 %1288 }
 0x8d1   :  { %v1324_v2 = vpack.c.bf16 %v1309_v46, %v1308_v42  ;;  %v1310_v16 = vmul.f32 %v1289_v35, %v1254_v39  ;;  %v1328_v22 = vpack.c.bf16 %v1317_v58, %v1316_v30  ;;  %v1318_v34 = vmul.f32 %v1289_v35, %v1270_v47 }
 0x8d3   :  { %2684 = vmatprep.mubr.msk.bf16.mxu1 %vm97_vm0, %v1324_v2 }
 0x8d4   :  { %v1291_v10 = vpop.permute.xlu1 %1290 }
 0x8d5   :  { %v1311_v59 = vmul.f32 %v1291_v10, %v1257_v50  ;;  %v1319_v7 = vmul.f32 %v1291_v10, %v1273_v0 }
 0x8d7   :  { %v1325_v17 = vpack.c.bf16 %v1311_v59, %v1310_v16  ;;  %v1329_v9 = vpack.c.bf16 %v1319_v7, %v1318_v34 }
 0x8d9   :  { %2685 = vmatmul.mubr.msk.bf16.vlgmr.msra.gmra.mrb[24].mxu1 %vm97_vm0, %v1325_v17 }
 0x8dc   :  { %v1293_v62 = vpop.permute.xlu0 %1292 }
 0x8dd   :  { %v1312_v19 = vmul.f32 %v1293_v62, %v1246_v21  ;;  %v1320_v12 = vmul.f32 %v1293_v62, %v1262_v55 }
 0x8de   :  { %v1295_v3 = vpop.permute.xlu1 %1294 }
 0x8df   :  { %v1313_v52 = vmul.f32 %v1295_v3, %v1249_v49  ;;  %v1321_v24 = vmul.f32 %v1295_v3, %v1265_v57 }
 0x8e0   :  { %v1297_v18 = vpop.permute.xlu0 %1296 }
 0x8e1   :  { %v1326_v5 = vpack.c.bf16 %v1313_v52, %v1312_v19  ;;  %v1314_v63 = vmul.f32 %v1297_v18, %v1254_v39  ;;  %v1330_v61 = vpack.c.bf16 %v1321_v24, %v1320_v12  ;;  %v1322_v11 = vmul.f32 %v1297_v18, %v1270_v47 }
 0x8e2   :  { %v1299_v45 = vpop.permute.xlu1 %1298 }
 0x8e3   :  { %v1315_v27 = vmul.f32 %v1299_v45, %v1257_v50  ;;  %2688 = vmatprep.mubr.msk.bf16.mxu1 %vm97_vm0, %v1326_v5  ;;  %v1323_v26 = vmul.f32 %v1299_v45, %v1273_v0 }
 0x8e5   :  { %v1327_v33 = vpack.c.bf16 %v1315_v27, %v1314_v63  ;;  %v1331_v14 = vpack.c.bf16 %v1323_v26, %v1322_v11  ;;  %v3549_v27 = vpop.permute.xlu0 %1573 }
 0x8e7   :  { %2689 = vmatmul.mubr.msk.bf16.gmra.mrb[28].mxu1 %vm97_vm0, %v1327_v33 }
 0x8e8   :  { %2692 = vmatprep.mubr.msk.bf16.mxu1 %vm97_vm0, %v1328_v22 }
 0x8ef   :  { %2693 = vmatmul.mubr.msk.bf16.gmra.mrb[32].mxu1 %vm97_vm0, %v1329_v9 }
 0x8f0   :  { %2696 = vmatprep.mubr.msk.bf16.mxu1 %vm97_vm0, %v1330_v61 }
 0x8f7   :  { %2697 = vmatmul.mubr.msk.bf16.gmra.mrb[36].mxu1 %vm97_vm0, %v1331_v14 }
 0x9ac   :  { %v2686_v41 = vpop.f32.mrb[24].mxu1 }
 0x9ad   :  { %v1390_v32 = vpop.f32.mrb[25].mxu1  ;;  %v1459_v31 = vsel %vm97_vm0, %v2686_v41, -inf }
 0x9ae   :  { %v2687_v40 = vpop.f32.mrb[26].mxu1  ;;  %v1453_v21 = vsel %vm97_vm0, %v1390_v32, -inf }
 0x9af   :  { %v1393_v36 = vpop.f32.mrb[27].mxu1  ;;  %v1462_v39 = vsel %vm97_vm0, %v2687_v40, -inf }
 0x9b0   :  { %v1456_v50 = vsel %vm97_vm0, %v1393_v36, -inf }
 0x9ba   :  { %v2690_v4 = vpop.f32.mrb[28].mxu1 }
 0x9bb   :  { %v1460_v44 = vsel %vm97_vm0, %v2690_v4, -inf  ;;  %v1406_v23 = vpop.f32.mrb[29].mxu1 }
 0x9bc   :  { %v1461_v60 = vmax.f32 %v1459_v31, %v1460_v44  ;;  %v1454_v28 = vsel %vm97_vm0, %v1406_v23, -inf  ;;  %v2691_v49 = vpop.f32.mrb[30].mxu1  ;;  %v3564_v44 = vpop.permute.xlu1 %1575 }
 0x9bd   :  { %v1455_v51 = vmax.f32 %v1453_v21, %v1454_v28  ;;  %v1463_v53 = vsel %vm97_vm0, %v2691_v49, -inf  ;;  %v1409_v55 = vpop.f32.mrb[31].mxu1 }
 0x9be   :  { %v1479_v56 = vsub.f32 %v2686_v41, %v1461_v60  ;;  %v1483_v20 = vsub.f32 %v2690_v4, %v1461_v60  ;;  %v1464_v57 = vmax.f32 %v1462_v39, %v1463_v53  ;;  %v1457_v47 = vsel %vm97_vm0, %v1409_v55, -inf }
 0x9bf   :  { %v1477_v0 = vsub.f32 %v1390_v32, %v1455_v51  ;;  %v1481_v1 = vsub.f32 %v1406_v23, %v1455_v51  ;;  %v1458_v48 = vmax.f32 %v1456_v50, %v1457_v47 }
 0x9c0   :  { %v1497_v42 = vmul.f32 1.442695, %v1479_v56  ;;  %v1505_v46 = vmul.f32 1.442695, %v1483_v20  ;;  %v1480_v35 = vsub.f32 %v2687_v40, %v1464_v57  ;;  %v1484_v2 = vsub.f32 %v2691_v49, %v1464_v57  ;;  %v3569_v56 = vpop.permute.xlu0 %1581 }
 0x9c1   :  { %v1493_v10 = vmul.f32 1.442695, %v1477_v0  ;;  %v1501_v16 = vmul.f32 1.442695, %v1481_v1  ;;  %v1478_v59 = vsub.f32 %v1393_v36, %v1458_v48  ;;  %v1482_v17 = vsub.f32 %v1409_v55, %v1458_v48 }
 0x9c2   :  { %2869 = vpow2.f32 %v1497_v42  ;;  %v1499_v62 = vmul.f32 1.442695, %v1480_v35  ;;  %v2694_v3 = vpop.f32.mrb[32].mxu1  ;;  %v1507_v19 = vmul.f32 1.442695, %v1484_v2 }
 0x9c3   :  { %2871 = vpow2.f32 %v1505_v46  ;;  %v1422_v52 = vpop.f32.mrb[33].mxu1  ;;  %v1495_v18 = vmul.f32 1.442695, %v1478_v59  ;;  %v1503_v58 = vmul.f32 1.442695, %v1482_v17  ;;  %v1471_v30 = vsel %vm97_vm0, %v2694_v3, -inf  ;;  %v3578_v17 = vpop.permute.xlu1 %1579 }
 0x9c4   :  { %2873 = vpow2.f32 %v1493_v10  ;;  %v2695_v5 = vpop.f32.mrb[34].mxu1  ;;  %v1465_v24 = vsel %vm97_vm0, %v1422_v52, -inf }
 0x9c5   :  { %2875 = vpow2.f32 %v1501_v16  ;;  %v3547_v45 = vpop.f32.mrb[35].mxu1  ;;  %v1474_v11 = vsel %vm97_vm0, %v2695_v5, -inf }
 0x9c6   :  { %2877 = vpow2.f32 %v1499_v62  ;;  %v1468_v2 = vsel %vm97_vm0, %v3547_v45, -inf }
 0x9c7   :  { %2879 = vpow2.f32 %v1507_v19 }
 0x9c8   :  { %2881 = vpow2.f32 %v1495_v18  ;;  %v3580_v18 = vpop.permute.xlu0 %1577 }
 0x9c9   :  { %2883 = vpow2.f32 %v1503_v58 }
 0x9ca   :  { %v2698_v63 = vpop.f32.mrb[36].mxu1 }
 0x9cb   :  { %v1472_v33 = vsel %vm97_vm0, %v2698_v63, -inf  ;;  %v1438_v22 = vpop.f32.mrb[37].mxu1 }
 0x9cc   :  { %v3553_v7 = vpop.eup %2869  ;;  %v1473_v34 = vmax.f32 %v1471_v30, %v1472_v33  ;;  %v1466_v12 = vsel %vm97_vm0, %v1438_v22, -inf  ;;  %v2699_v9 = vpop.f32.mrb[38].mxu1 }
 0x9cd   :  { %v2872_v61 = vpop.eup %2871  ;;  %v1531_v26 = vsel %vm97_vm0, %v3553_v7, 0.0  ;;  %v1467_v14 = vmax.f32 %v1465_v24, %v1466_v12  ;;  %v1475_v15 = vsel %vm97_vm0, %v2699_v9, -inf  ;;  %v1441_v13 = vpop.f32.mrb[39].mxu1 }
 0x9ce   :  { %v3561_v41 = vpop.eup %2873  ;;  %v1532_v32 = vsel %vm97_vm0, %v2872_v61, 0.0  ;;  %v1487_v40 = vsub.f32 %v2694_v3, %v1473_v34  ;;  %v1491_v36 = vsub.f32 %v2698_v63, %v1473_v34  ;;  %v1476_v4 = vmax.f32 %v1474_v11, %v1475_v15 }
 0x9cf   :  { %v2876_v31 = vpop.eup %2875  ;;  %v1533_v23 = vadd.f32 %v1532_v32, %v1531_v26  ;;  %v1525_v21 = vsel %vm97_vm0, %v3561_v41, 0.0  ;;  %v1485_v60 = vsub.f32 %v1422_v52, %v1467_v14  ;;  %v1489_v28 = vsub.f32 %v1438_v22, %v1467_v14  ;;  %v3583_v22 = vpop.permute.xlu1 %1583 }
 0x9d0   :  { %v2878_v49 = vpop.eup %2877  ;;  %v1526_v39 = vsel %vm97_vm0, %v2876_v31, 0.0  ;;  %v1513_v50 = vmul.f32 1.442695, %v1487_v40  ;;  %v1521_v51 = vmul.f32 1.442695, %v1491_v36  ;;  %v1488_v53 = vsub.f32 %v2695_v5, %v1476_v4  ;;  %v1586_v26 = vpop.permute.xlu0 %1585 }
 0x9d1   :  { %v2880_v55 = vpop.eup %2879  ;;  %2885 = vrcp.f32 %v1533_v23  ;;  %v1527_v20 = vadd.f32 %v1526_v39, %v1525_v21  ;;  %v1534_v57 = vsel %vm97_vm0, %v2878_v49, 0.0  ;;  %v1509_v1 = vmul.f32 1.442695, %v1485_v60 }
 0x9d2   :  { %v2882_v47 = vpop.eup %2881  ;;  %v1535_v0 = vsel %vm97_vm0, %v2880_v55, 0.0  ;;  %2887 = vpow2.f32 %v1513_v50  ;;  %v1492_v48 = vsub.f32 %v2699_v9, %v1476_v4  ;;  %v1517_v16 = vmul.f32 1.442695, %v1489_v28 }
 0x9d3   :  { %v2884_v42 = vpop.eup %2883  ;;  %2889 = vrcp.f32 %v1527_v20  ;;  %v1536_v46 = vadd.f32 %v1535_v0, %v1534_v57  ;;  %v1528_v35 = vsel %vm97_vm0, %v2882_v47, 0.0  ;;  %v1469_v59 = vsel %vm97_vm0, %v1441_v13, -inf  ;;  %v3595_v28 = vpop.permute.xlu1 %1587 }
 0x9d4   :  { %v1529_v10 = vsel %vm97_vm0, %v2884_v42, 0.0  ;;  %2891 = vpow2.f32 %v1521_v51  ;;  %v1515_v3 = vmul.f32 1.442695, %v1488_v53  ;;  %v1470_v19 = vmax.f32 %v1468_v2, %v1469_v59 }
 0x9d5   :  { %2893 = vrcp.f32 %v1536_v46  ;;  %v1530_v62 = vadd.f32 %v1529_v10, %v1528_v35  ;;  %v1523_v52 = vmul.f32 1.442695, %v1492_v48 }
 0x9d6   :  { %2895 = vpow2.f32 %v1509_v1  ;;  %v1486_v5 = vsub.f32 %v3547_v45, %v1470_v19  ;;  %v1490_v58 = vsub.f32 %v1441_v13, %v1470_v19 }
 0x9d7   :  { %2897 = vrcp.f32 %v1530_v62 }
 0x9d8   :  { %2899 = vpow2.f32 %v1517_v16  ;;  %v1511_v63 = vmul.f32 1.442695, %v1486_v5  ;;  %v1519_v30 = vmul.f32 1.442695, %v1490_v58 }
 0x9d9   :  { %2901 = vpow2.f32 %v1515_v3 }
 0x9da   :  { %2903 = vpow2.f32 %v1523_v52 }
 0x9db   :  { %v2886_v33 = vpop.eup %2885  ;;  %2905 = vpow2.f32 %v1511_v63 }
 0x9dc   :  { %v3585_v24 = vpop.eup %2887  ;;  %v1559_v34 = vmul.f32 %v2886_v33, %v3553_v7  ;;  %v1563_v12 = vmul.f32 %v2886_v33, %v2872_v61  ;;  %2907 = vpow2.f32 %v1519_v30 }
 0x9dd   :  { %v2890_v9 = vpop.eup %2889  ;;  %v1543_v45 = vsel %vm97_vm0, %v3585_v24, 0.0 }
 0x9de   :  { %v2892_v11 = vpop.eup %2891  ;;  %v1599_v14 = vmul.f32 %v3580_v18, %v1559_v34  ;;  %v1603_v15 = vmul.f32 %v1586_v26, %v1563_v12  ;;  %v1561_v13 = vmul.f32 %v2890_v9, %v2876_v31  ;;  %v1557_v32 = vmul.f32 %v2890_v9, %v3561_v41 }
 0x9df   :  { %v2894_v40 = vpop.eup %2893  ;;  %v1544_v36 = vsel %vm97_vm0, %v2892_v11, 0.0 }
 0x9e0   :  { %v2896_v4 = vpop.eup %2895  ;;  %v1619_v7 = vsel %vm97_vm0, %v1599_v14, 0.0  ;;  %v1620_v61 = vsel %vm97_vm0, %v1603_v15, 0.0  ;;  %v1560_v23 = vmul.f32 %v2894_v40, %v2878_v49  ;;  %v1564_v21 = vmul.f32 %v2894_v40, %v2880_v55 }
 0x9e1   :  { %v2898_v60 = vpop.eup %2897  ;;  %v1621_v39 = vadd.f32 %v1620_v61, %v1619_v7  ;;  %v1545_v50 = vadd.f32 %v1544_v36, %v1543_v45  ;;  %v1537_v51 = vsel %vm97_vm0, %v2896_v4, 0.0  ;;  %v1597_v31 = vmul.f32 %v3549_v27, %v1557_v32 }
 0x9e2   :  { %v2900_v41 = vpop.eup %2899  ;;  %v1600_v53 = vmul.f32 %v3578_v17, %v1560_v23  ;;  %v1604_v20 = vmul.f32 %v3595_v28, %v1564_v21  ;;  %v1562_v57 = vmul.f32 %v2898_v60, %v2884_v42  ;;  %v1558_v0 = vmul.f32 %v2898_v60, %v2882_v47 }
 0x9e3   :  { %v2902_v1 = vpop.eup %2901  ;;  %2909 = vrcp.f32 %v1545_v50  ;;  %v1538_v49 = vsel %vm97_vm0, %v2900_v41, 0.0  ;;  %v1601_v55 = vmul.f32 %v3569_v56, %v1561_v13  ;;  %v1613_v48 = vsel %vm97_vm0, %v1597_v31, 0.0 }
 0x9e4   :  { %v2904_v46 = vpop.eup %2903  ;;  %v1622_v35 = vsel %vm97_vm0, %v1600_v53, 0.0  ;;  %v1623_v2 = vsel %vm97_vm0, %v1604_v20, 0.0  ;;  %v1539_v10 = vadd.f32 %v1538_v49, %v1537_v51  ;;  %v1546_v16 = vsel %vm97_vm0, %v2902_v1, 0.0 }
 0x9e5   :  { %v2906_v59 = vpop.eup %2905  ;;  %v1624_v62 = vadd.f32 %v1623_v2, %v1622_v35  ;;  %v1547_v47 = vsel %vm97_vm0, %v2904_v46, 0.0  ;;  %v1598_v42 = vmul.f32 %v3564_v44, %v1558_v0  ;;  %v1602_v3 = vmul.f32 %v3583_v22, %v1562_v57 }
 0x9e6   :  { %v2908_v19 = vpop.eup %2907  ;;  %2911 = vrcp.f32 %v1539_v10  ;;  %v1548_v52 = vadd.f32 %v1547_v47, %v1546_v16  ;;  %v1540_v5 = vsel %vm97_vm0, %v2906_v59, 0.0  ;;  %v1614_v58 = vsel %vm97_vm0, %v1601_v55, 0.0 }
 0x9e7   :  { %v1541_v63 = vsel %vm97_vm0, %v2908_v19, 0.0  ;;  %v1615_v30 = vadd.f32 %v1614_v58, %v1613_v48  ;;  %v1616_v33 = vsel %vm97_vm0, %v1598_v42, 0.0  ;;  %v1617_v34 = vsel %vm97_vm0, %v1602_v3, 0.0 }
 0x9e8   :  { %2913 = vrcp.f32 %v1548_v52  ;;  %v1542_v12 = vadd.f32 %v1541_v63, %v1540_v5  ;;  %v1618_v9 = vadd.f32 %v1617_v34, %v1616_v33  ;;  %v1638_v45 = vpack.c.bf16 %v1624_v62, %v1621_v39 }
 0x9ea   :  { %2915 = vrcp.f32 %v1542_v12  ;;  %v1637_v14 = vpack.c.bf16 %v1618_v9, %v1615_v30 }
 0x9ec   :  { %2704 = vmatprep.mubr.msk.bf16.mxu0 %vm97_vm0, %v1637_v14 }
 0x9ed   :  { %v2910_v15 = vpop.eup %2909  ;;  %2705 = vmatmul.mubr.msk.bf16.vlgmr.msra.gmra.mrb[32].mxu0 %vm97_vm0, %v1638_v45 }
 0x9ee   :  { %v1571_v13 = vmul.f32 %v2910_v15, %v2892_v11  ;;  %v1567_v32 = vmul.f32 %v2910_v15, %v3585_v24 }
 0x9f0   :  { %v2912_v40 = vpop.eup %2911  ;;  %v1607_v36 = vmul.f32 %v3580_v18, %v1567_v32  ;;  %v1611_v7 = vmul.f32 %v1586_v26, %v1571_v13 }
 0x9f1   :  { %v1569_v61 = vmul.f32 %v2912_v40, %v2900_v41  ;;  %v1565_v23 = vmul.f32 %v2912_v40, %v2896_v4 }
 0x9f2   :  { %v2914_v21 = vpop.eup %2913  ;;  %v1631_v60 = vsel %vm97_vm0, %v1607_v36, 0.0  ;;  %v1632_v39 = vsel %vm97_vm0, %v1611_v7, 0.0 }
 0x9f3   :  { %v1572_v50 = vmul.f32 %v2914_v21, %v2904_v46  ;;  %v1605_v51 = vmul.f32 %v3549_v27, %v1565_v23  ;;  %v1609_v31 = vmul.f32 %v3569_v56, %v1569_v61  ;;  %v1568_v53 = vmul.f32 %v2914_v21, %v2902_v1 }
 0x9f4   :  { %v2916_v11 = vpop.eup %2915  ;;  %v1633_v20 = vadd.f32 %v1632_v39, %v1631_v60 }
 0x9f5   :  { %v1570_v24 = vmul.f32 %v2916_v11, %v2908_v19  ;;  %v1566_v57 = vmul.f32 %v2916_v11, %v2906_v59  ;;  %v1625_v18 = vsel %vm97_vm0, %v1605_v51, 0.0  ;;  %v1626_v26 = vsel %vm97_vm0, %v1609_v31, 0.0 }
 0x9f6   :  { %v1627_v4 = vadd.f32 %v1626_v26, %v1625_v18  ;;  %v1608_v41 = vmul.f32 %v3578_v17, %v1568_v53  ;;  %v1612_v0 = vmul.f32 %v3595_v28, %v1572_v50 }
 0x9f7   :  { %v1606_v49 = vmul.f32 %v3564_v44, %v1566_v57  ;;  %v1610_v27 = vmul.f32 %v3583_v22, %v1570_v24  ;;  %v2466_v44 = vld [vmem:[%s3876_s8 + $0x1] ss:$0 sm:$0xff] }
 0x9f8   :  { %v1634_v56 = vsel %vm97_vm0, %v1608_v41, 0.0  ;;  %v1635_v1 = vsel %vm97_vm0, %v1612_v0, 0.0 }
 0x9f9   :  { %v1628_v55 = vsel %vm97_vm0, %v1606_v49, 0.0  ;;  %v1629_v48 = vsel %vm97_vm0, %v1610_v27, 0.0  ;;  %v1636_v46 = vadd.f32 %v1635_v1, %v1634_v56 }
 0x9fa   :  { %v1630_v35 = vadd.f32 %v1629_v48, %v1628_v55 }
 0x9fb   :  { %v1640_v2 = vpack.c.bf16 %v1636_v46, %v1633_v20 }
 0x9fc   :  { %v1639_v10 = vpack.c.bf16 %v1630_v35, %v1627_v4 }
 0x9fe   :  { %2708 = vmatprep.mubr.msk.bf16.mxu0 %vm97_vm0, %v1639_v10 }
 0x9ff   :  { %2709 = vmatmul.mubr.msk.bf16.gmra.mrb[36].mxu0 %vm97_vm0, %v1640_v2 }
 0xac0   :  { %v2706_v17 = vpop.f32.mrb[32].mxu0 }
 0xac1   :  { %v1712_v22 = vpop.f32.mrb[33].mxu0  ;;  %v1721_v28 = vadd.f32 %v2706_v17, %v2466_v44 }
 0xac2   :  { %v1713_v16 = vadd.f32 %v2466_v44, %v1712_v22  ;;  %v2707_v59 = vpop.f32.mrb[34].mxu0 }
 0xac3   :  { %v1715_v62 = vpop.f32.mrb[35].mxu0  ;;  %v1724_v3 = vadd.f32 %v2707_v59, %v2466_v44  ;;  %v1745_v5 = vadd.f32 %v1721_v28, %v3480_v29 }
 0xac4   :  { %v1716_v47 = vadd.f32 %v2466_v44, %v1715_v62  ;;  %v1743_v42 = vadd.f32 %v1713_v16, %v3474_v6 }
 0xac5   :  { %v1761_v63 = vsel %vm97_vm0, %v1745_v5, 0.0  ;;  %v1746_v30 = vadd.f32 %v1724_v3, %v3482_v8  ;;  %v2781_v3 = vld [vmem:[%s3879_s11 + $0x10] sm:$0xff]  }
 0xac6   :  { %v1755_v19 = vsel %vm97_vm0, %v1743_v42, 0.0  ;;  %v1744_v52 = vadd.f32 %v1716_v47, %v3476_v25  ;;  %2712 = vmatprep.subr.bf16.mxu0 %v2781_v3 }
 0xac7   :  { %1756 = vadd.xlane.f32.xlu0 %v1755_v19  ;;  %v1764_v33 = vsel %vm97_vm0, %v1746_v30, 0.0  ;;  %2713 = vmatpush3.bf16.msra.mxu0 %v2781_v3  ;;  %v2782_v19 = vld [vmem:[%s3879_s11 + $0x18] sm:$0xff]  }
 0xac8   :  { %v1758_v58 = vsel %vm97_vm0, %v1744_v52, 0.0  ;;  %2714 = vmatprep.subr.bf16.mxu0 %v2782_v19 }
 0xac9   :  { %1759 = vadd.xlane.f32.xlu1 %v1758_v58 }
 0xacb   :  { %1762 = vadd.xlane.f32.xlu0 %v1761_v63  ;;  %2715 = vmatpush3.bf16.msra.mxu0 %v2782_v19 }
 0xacf   :  { %1765 = vadd.xlane.f32.xlu0 %v1764_v33 }
 0xad2   :  { %v2710_v6 = vpop.f32.mrb[36].mxu0 }
 0xad3   :  { %v1728_v34 = vpop.f32.mrb[37].mxu0  ;;  %v1737_v12 = vadd.f32 %v2710_v6, %v2466_v44 }
 0xad4   :  { %v1729_v9 = vadd.f32 %v2466_v44, %v1728_v34  ;;  %v2711_v45 = vpop.f32.mrb[38].mxu0 }
 0xad5   :  { %v1731_v25 = vpop.f32.mrb[39].mxu0  ;;  %v1740_v14 = vadd.f32 %v2711_v45, %v2466_v44  ;;  %v1749_v8 = vadd.f32 %v1737_v12, %v3499_v38 }
 0xad6   :  { %v1732_v29 = vadd.f32 %v2466_v44, %v1731_v25  ;;  %v1747_v15 = vadd.f32 %v1729_v9, %v3492_v54 }
 0xad7   :  { %v1750_v36 = vadd.f32 %v1740_v14, %v3501_v43  ;;  %v1773_v7 = vsel %vm97_vm0, %v1749_v8, 0.0 }
 0xad8   :  { %v1767_v13 = vsel %vm97_vm0, %v1747_v15, 0.0  ;;  %v1748_v32 = vadd.f32 %v1732_v29, %v3494_v37 }
 0xad9   :  { %1768 = vadd.xlane.f32.xlu1 %v1767_v13  ;;  %v1776_v61 = vsel %vm97_vm0, %v1750_v36, 0.0  ;;  %v2475_v13 = vld [vmem:[%s3877_s9 + $0x1] ss:$0 sm:$0xff] }
 0xada   :  { %v1770_v40 = vsel %vm97_vm0, %v1748_v32, 0.0 }
 0xadb   :  { %1771 = vadd.xlane.f32.xlu0 %v1770_v40 }
 0xadd   :  { %1774 = vadd.xlane.f32.xlu1 %v1773_v7 }
 0xadf   :  { %1777 = vadd.xlane.f32.xlu0 %v1776_v61 }
 0xb54   :  { %v1757_v23 = vpop.xlane.xlu0 %1756 }
 0xb55   :  { %v1779_v54 = vmul.f32 0.03125, %v1757_v23  ;;  %v2476_v23 = vld [vmem:[%s3878_s10 + $0x1] ss:$0 sm:$0xff] }
 0xb56   :  { %v1760_v21 = vpop.xlane.xlu1 %1759 }
 0xb57   :  { %v3654_v60 = vsub.f32 %v1743_v42, %v1779_v54  ;;  %v1780_v37 = vmul.f32 0.03125, %v1760_v21 }
 0xb58   :  { %v1763_v39 = vpop.xlane.xlu0 %1762 }
 0xb59   :  { %v3656_v38 = vsub.f32 %v1744_v52, %v1780_v37  ;;  %v1781_v50 = vmul.f32 0.03125, %v1763_v39  ;;  %v1795_v43 = vmul.f32 %v3654_v60, %v3654_v60  ;;  %v2783_v52 = vld [vmem:[%s3881_s13 + $0x20] sm:$0xff]  }
 0xb5a   :  { %2724 = vmatprep.subr.bf16.mxu1 %v2783_v52 }
 0xb5b   :  { %v3660_v51 = vsub.f32 %v1745_v5, %v1781_v50  ;;  %v1803_v31 = vsel %vm97_vm0, %v1795_v43, 0.0  ;;  %v1796_v53 = vmul.f32 %v3656_v38, %v3656_v38  ;;  %v2784_v5 = vld [vmem:[%s3881_s13 + $0x28] sm:$0xff]   ;;  %2725 = vmatpush3.bf16.msra.mxu1 %v2783_v52 }
 0xb5c   :  { %1804 = vadd.xlane.f32.xlu1 %v1803_v31  ;;  %v1766_v11 = vpop.xlane.xlu0 %1765  ;;  %2726 = vmatprep.subr.bf16.mxu1 %v2784_v5 }
 0xb5d   :  { %v1782_v20 = vmul.f32 0.03125, %v1766_v11  ;;  %v1806_v24 = vsel %vm97_vm0, %v1796_v53, 0.0  ;;  %v1797_v57 = vmul.f32 %v3660_v51, %v3660_v51 }
 0xb5e   :  { %1807 = vadd.xlane.f32.xlu0 %v1806_v24 }
 0xb5f   :  { %v3668_v18 = vsub.f32 %v1746_v30, %v1782_v20  ;;  %v1809_v26 = vsel %vm97_vm0, %v1797_v57, 0.0  ;;  %2727 = vmatpush3.bf16.msra.mxu1 %v2784_v5  ;;  %v2786_v5 = vld [vmem:[%s3881_s13 + $0x38] sm:$0xff]  }
 0xb60   :  { %1810 = vadd.xlane.f32.xlu1 %v1809_v26 }
 0xb61   :  { %v1798_v4 = vmul.f32 %v3668_v18, %v3668_v18 }
 0xb63   :  { %v1812_v41 = vsel %vm97_vm0, %v1798_v4, 0.0 }
 0xb64   :  { %1813 = vadd.xlane.f32.xlu0 %v1812_v41 }
 0xb66   :  { %v1769_v0 = vpop.xlane.xlu1 %1768 }
 0xb67   :  { %v1783_v49 = vmul.f32 0.03125, %v1769_v0 }
 0xb68   :  { %v1772_v27 = vpop.xlane.xlu0 %1771 }
 0xb69   :  { %v3674_v56 = vsub.f32 %v1747_v15, %v1783_v49  ;;  %v1784_v1 = vmul.f32 0.03125, %v1772_v27 }
 0xb6a   :  { %v1775_v55 = vpop.xlane.xlu1 %1774 }
 0xb6b   :  { %v3676_v48 = vsub.f32 %v1748_v32, %v1784_v1  ;;  %v1785_v46 = vmul.f32 0.03125, %v1775_v55  ;;  %v1799_v35 = vmul.f32 %v3674_v56, %v3674_v56 }
 0xb6c   :  { %v1778_v2 = vpop.xlane.xlu0 %1777 }
 0xb6d   :  { %v3680_v10 = vsub.f32 %v1749_v8, %v1785_v46  ;;  %v1786_v44 = vmul.f32 0.03125, %v1778_v2  ;;  %v1815_v17 = vsel %vm97_vm0, %v1799_v35, 0.0  ;;  %v1800_v22 = vmul.f32 %v3676_v48, %v3676_v48 }
 0xb6e   :  { %1816 = vadd.xlane.f32.xlu1 %v1815_v17 }
 0xb6f   :  { %v3685_v28 = vsub.f32 %v1750_v36, %v1786_v44  ;;  %v1818_v16 = vsel %vm97_vm0, %v1800_v22, 0.0  ;;  %v1801_v59 = vmul.f32 %v3680_v10, %v3680_v10 }
 0xb70   :  { %1819 = vadd.xlane.f32.xlu0 %v1818_v16 }
 0xb71   :  { %v1821_v62 = vsel %vm97_vm0, %v1801_v59, 0.0  ;;  %v1802_v47 = vmul.f32 %v3685_v28, %v3685_v28 }
 0xb72   :  { %1822 = vadd.xlane.f32.xlu1 %v1821_v62 }
 0xb73   :  { %v1824_v42 = vsel %vm97_vm0, %v1802_v47, 0.0 }
 0xb74   :  { %1825 = vadd.xlane.f32.xlu0 %v1824_v42 }
 0xbe9   :  { %v1805_v58 = vpop.xlane.xlu1 %1804 }
 0xbea   :  { %v1827_v63 = vmul.f32 0.03125, %v1805_v58  ;;  %v2482_v58 = vld [vmem:[%s3880_s12 + $0x1] ss:$0 sm:$0xff] }
 0xbeb   :  { %v1808_v30 = vpop.xlane.xlu0 %1807 }
 0xbec   :  { %v1835_v33 = vadd.f32 1e-06, %v1827_v63  ;;  %v1828_v6 = vmul.f32 0.03125, %v1808_v30 }
 0xbed   :  { %v1811_v34 = vpop.xlane.xlu1 %1810 }
 0xbee   :  { %2917 = vrsqrt.f32 %v1835_v33  ;;  %v1836_v12 = vadd.f32 1e-06, %v1828_v6  ;;  %v1829_v9 = vmul.f32 0.03125, %v1811_v34 }
 0xbf0   :  { %2919 = vrsqrt.f32 %v1836_v12  ;;  %v1837_v45 = vadd.f32 1e-06, %v1829_v9 }
 0xbf1   :  { %v1814_v25 = vpop.xlane.xlu0 %1813 }
 0xbf2   :  { %2921 = vrsqrt.f32 %v1837_v45  ;;  %v1830_v14 = vmul.f32 0.03125, %v1814_v25 }
 0xbf4   :  { %v1838_v29 = vadd.f32 1e-06, %v1830_v14 }
 0xbf6   :  { %2923 = vrsqrt.f32 %v1838_v29 }
 0xbf8   :  { %v2918_v15 = vpop.eup %2917 }
 0xbf9   :  { %v1851_v32 = vmul.f32 %v2918_v15, %v3654_v60 }
 0xbfa   :  { %v2920_v8 = vpop.eup %2919 }
 0xbfb   :  { %v1852_v40 = vmul.f32 %v2920_v8, %v3656_v38  ;;  %v1817_v36 = vpop.xlane.xlu1 %1816  ;;  %v1865_v7 = vmul.f32 %v2475_v13, %v1851_v32 }
 0xbfc   :  { %v2922_v61 = vpop.eup %2921  ;;  %v1831_v54 = vmul.f32 0.03125, %v1817_v36 }
 0xbfd   :  { %v1853_v21 = vmul.f32 %v2922_v61, %v3660_v51  ;;  %v1820_v37 = vpop.xlane.xlu0 %1819  ;;  %v1866_v39 = vmul.f32 %v2475_v13, %v1852_v40  ;;  %v3715_v53 = vadd.f32 %v2476_v23, %v1865_v7 }
 0xbfe   :  { %v1839_v50 = vadd.f32 1e-06, %v1831_v54  ;;  %v1832_v43 = vmul.f32 0.03125, %v1820_v37 }
 0xbff   :  { %v1823_v31 = vpop.xlane.xlu1 %1822  ;;  %v3717_v60 = vadd.f32 %v2476_v23, %v1866_v39  ;;  %v1867_v24 = vmul.f32 %v2475_v13, %v1853_v21 }
 0xc00   :  { %v2924_v38 = vpop.eup %2923  ;;  %2925 = vrsqrt.f32 %v1839_v50  ;;  %v1840_v11 = vadd.f32 1e-06, %v1832_v43  ;;  %v1833_v20 = vmul.f32 0.03125, %v1823_v31 }
 0xc01   :  { %v1854_v57 = vmul.f32 %v2924_v38, %v3668_v18  ;;  %v1826_v26 = vpop.xlane.xlu0 %1825  ;;  %v1887_v51 = vpack.c.bf16 %v3717_v60, %v3715_v53  ;;  %v3723_v27 = vadd.f32 %v2476_v23, %v1867_v24 }
 0xc02   :  { %2927 = vrsqrt.f32 %v1840_v11  ;;  %v1841_v4 = vadd.f32 1e-06, %v1833_v20  ;;  %v1834_v41 = vmul.f32 0.03125, %v1826_v26  ;;  %v2498_v11 = vld [vmem:[%s3882_s14 + $0x1] ss:$0 sm:$0xff] }
 0xc03   :  { %v1868_v0 = vmul.f32 %v2475_v13, %v1854_v57  ;;  %2716 = vmatprep.mubr.msk.bf16.mxu0 %vm97_vm0, %v1887_v51 }
 0xc04   :  { %2929 = vrsqrt.f32 %v1841_v4  ;;  %v1842_v49 = vadd.f32 1e-06, %v1834_v41 }
 0xc05   :  { %v3725_v1 = vadd.f32 %v2476_v23, %v1868_v0 }
 0xc06   :  { %2931 = vrsqrt.f32 %v1842_v49 }
 0xc07   :  { %v1888_v18 = vpack.c.bf16 %v3725_v1, %v3723_v27 }
 0xc09   :  { %2717 = vmatmul.mubr.msk.bf16.vlgmr.msra.gmra.mrb[40].mxu0 %vm97_vm0, %v1888_v18 }
 0xc0a   :  { %v2926_v55 = vpop.eup %2925 }
 0xc0b   :  { %v1855_v46 = vmul.f32 %v2926_v55, %v3674_v56 }
 0xc0c   :  { %v2928_v35 = vpop.eup %2927 }
 0xc0d   :  { %v1856_v2 = vmul.f32 %v2928_v35, %v3676_v48  ;;  %v1869_v44 = vmul.f32 %v2475_v13, %v1855_v46 }
 0xc0e   :  { %v2930_v17 = vpop.eup %2929 }
 0xc0f   :  { %v1857_v22 = vmul.f32 %v2930_v17, %v3680_v10  ;;  %v1870_v16 = vmul.f32 %v2475_v13, %v1856_v2  ;;  %v3734_v47 = vadd.f32 %v2476_v23, %v1869_v44 }
 0xc10   :  { %v2932_v59 = vpop.eup %2931 }
 0xc11   :  { %v1858_v62 = vmul.f32 %v2932_v59, %v3685_v28  ;;  %v3736_v42 = vadd.f32 %v2476_v23, %v1870_v16  ;;  %v1871_v3 = vmul.f32 %v2475_v13, %v1857_v22  ;;  %v2785_v28 = vld [vmem:[%s3881_s13 + $0x30] sm:$0xff]  }
 0xc12   :  { %2728 = vmatprep.subr.bf16.mxu1 %v2785_v28 }
 0xc13   :  { %v1889_v19 = vpack.c.bf16 %v3736_v42, %v3734_v47  ;;  %v1872_v56 = vmul.f32 %v2475_v13, %v1858_v62  ;;  %v3741_v48 = vadd.f32 %v2476_v23, %v1871_v3  ;;  %2729 = vmatpush3.bf16.msra.mxu1 %v2785_v28 }
 0xc14   :  { %2730 = vmatprep.subr.bf16.mxu1 %v2786_v5 }
 0xc15   :  { %2720 = vmatprep.mubr.msk.bf16.mxu0 %vm97_vm0, %v1889_v19  ;;  %v3743_v52 = vadd.f32 %v2476_v23, %v1872_v56 }
 0xc17   :  { %v1890_v10 = vpack.c.bf16 %v3743_v52, %v3741_v48  ;;  %2731 = vmatpush3.bf16.msra.mxu1 %v2786_v5 }
 0xc19   :  { %2721 = vmatmul.mubr.msk.bf16.gmra.mrb[44].mxu0 %vm97_vm0, %v1890_v10 }
 0xcdc   :  { %v2718_v63 = vpop.f32.mrb[40].mxu0 }
 0xcdd   :  { %v1971_v30 = vadd.f32 %v2718_v63, %v2482_v58  ;;  %v1962_v33 = vpop.f32.mrb[41].mxu0 }
 0xcde   :  { %v1963_v6 = vadd.f32 %v2482_v58, %v1962_v33  ;;  %v2719_v34 = vpop.f32.mrb[42].mxu0 }
 0xcdf   :  { %v1974_v12 = vadd.f32 %v2719_v34, %v2482_v58  ;;  %v1965_v9 = vpop.f32.mrb[43].mxu0  ;;  %v1995_v25 = vmax.f32 %v1971_v30, 0.0 }
 0xce0   :  { %v1966_v45 = vadd.f32 %v2482_v58, %v1965_v9  ;;  %v1993_v29 = vmax.f32 %v1963_v6, 0.0 }
 0xce1   :  { %v1996_v14 = vmax.f32 %v1974_v12, 0.0 }
 0xce2   :  { %v1994_v15 = vmax.f32 %v1966_v45, 0.0 }
 0xce3   :  { %v2002_v13 = vpack.c.bf16 %v1996_v14, %v1995_v25 }
 0xce4   :  { %v2001_v32 = vpack.c.bf16 %v1994_v15, %v1993_v29 }
 0xce6   :  { %2732 = vmatprep.mubr.msk.bf16.mxu1 %vm950_vm1, %v2001_v32 }
 0xce7   :  { %2733 = vmatmul.mubr.msk.bf16.vlgmr.msra.gmra.mrb[40].mxu1 %vm950_vm1, %v2002_v13 }
 0xcec   :  { %v2722_v8 = vpop.f32.mrb[44].mxu0 }
 0xced   :  { %v1987_v40 = vadd.f32 %v2722_v8, %v2482_v58  ;;  %v1978_v36 = vpop.f32.mrb[45].mxu0 }
 0xcee   :  { %v1979_v7 = vadd.f32 %v2482_v58, %v1978_v36  ;;  %v2723_v61 = vpop.f32.mrb[46].mxu0 }
 0xcef   :  { %v1990_v23 = vadd.f32 %v2723_v61, %v2482_v58  ;;  %v1981_v54 = vpop.f32.mrb[47].mxu0  ;;  %v1999_v37 = vmax.f32 %v1987_v40, 0.0 }
 0xcf0   :  { %v1982_v21 = vadd.f32 %v2482_v58, %v1981_v54  ;;  %v1997_v50 = vmax.f32 %v1979_v7, 0.0 }
 0xcf1   :  { %v2000_v39 = vmax.f32 %v1990_v23, 0.0 }
 0xcf2   :  { %v1998_v43 = vmax.f32 %v1982_v21, 0.0 }
 0xcf3   :  { %v2004_v31 = vpack.c.bf16 %v2000_v39, %v1999_v37 }
 0xcf4   :  { %v2003_v38 = vpack.c.bf16 %v1998_v43, %v1997_v50 }
 0xcf6   :  { %2736 = vmatprep.mubr.msk.bf16.mxu1 %vm950_vm1, %v2003_v38 }
 0xcf7   :  { %2737 = vmatmul.mubr.msk.bf16.gmra.mrb[44].mxu1 %vm950_vm1, %v2004_v31 }
 0xdba   :  { %v2734_v20 = vpop.f32.mrb[40].mxu1 }
 0xdbb   :  { %v2092_v24 = vpop.f32.mrb[41].mxu1  ;;  %v2101_v57 = vadd.f32 %v2734_v20, %v2498_v11 }
 0xdbc   :  { %v2093_v26 = vadd.f32 %v2498_v11, %v2092_v24  ;;  %v2735_v51 = vpop.f32.mrb[42].mxu1 }
 0xdbd   :  { %v2095_v4 = vpop.f32.mrb[43].mxu1  ;;  %v2104_v41 = vadd.f32 %v2735_v51, %v2498_v11  ;;  %v2125_v46 = vadd.f32 %v2101_v57, %v3723_v27 }
 0xdbe   :  { %v2096_v0 = vadd.f32 %v2498_v11, %v2095_v4  ;;  %v2123_v49 = vadd.f32 %v2093_v26, %v3715_v53 }
 0xdbf   :  { %v2126_v2 = vadd.f32 %v2104_v41, %v3725_v1  ;;  %v2141_v44 = vsel %vm97_vm0, %v2125_v46, 0.0 }
 0xdc0   :  { %v2135_v18 = vsel %vm97_vm0, %v2123_v49, 0.0  ;;  %v2124_v55 = vadd.f32 %v2096_v0, %v3717_v60 }
 0xdc1   :  { %2136 = vadd.xlane.f32.xlu1 %v2135_v18  ;;  %v2144_v17 = vsel %vm97_vm0, %v2126_v2, 0.0  ;;  %v2787_v18 = vld [vmem:[%s3871_s3] sm:$0xff]  }
 0xdc2   :  { %v2138_v35 = vsel %vm97_vm0, %v2124_v55, 0.0 }
 0xdc3   :  { %2139 = vadd.xlane.f32.xlu0 %v2138_v35 }
 0xdc5   :  { %2142 = vadd.xlane.f32.xlu1 %v2141_v44 }
 0xdc7   :  { %2145 = vadd.xlane.f32.xlu0 %v2144_v17 }
 0xdca   :  { %v2738_v22 = vpop.f32.mrb[44].mxu1 }
 0xdcb   :  { %v2108_v53 = vpop.f32.mrb[45].mxu1  ;;  %v2117_v16 = vadd.f32 %v2738_v22, %v2498_v11 }
 0xdcc   :  { %v2109_v59 = vadd.f32 %v2498_v11, %v2108_v53  ;;  %v2739_v62 = vpop.f32.mrb[46].mxu1 }
 0xdcd   :  { %v2111_v60 = vpop.f32.mrb[47].mxu1  ;;  %v2120_v3 = vadd.f32 %v2739_v62, %v2498_v11  ;;  %v2129_v10 = vadd.f32 %v2117_v16, %v3741_v48 }
 0xdce   :  { %v2112_v27 = vadd.f32 %v2498_v11, %v2111_v60  ;;  %v2127_v19 = vadd.f32 %v2109_v59, %v3734_v47 }
 0xdcf   :  { %v2130_v5 = vadd.f32 %v2120_v3, %v3743_v52  ;;  %v2153_v58 = vsel %vm97_vm0, %v2129_v10, 0.0 }
 0xdd0   :  { %v2147_v56 = vsel %vm97_vm0, %v2127_v19, 0.0  ;;  %v2128_v1 = vadd.f32 %v2112_v27, %v3736_v42 }
 0xdd1   :  { %2148 = vadd.xlane.f32.xlu1 %v2147_v56  ;;  %v2156_v63 = vsel %vm97_vm0, %v2130_v5, 0.0 }
 0xdd2   :  { %v2150_v28 = vsel %vm97_vm0, %v2128_v1, 0.0 }
 0xdd3   :  { %2151 = vadd.xlane.f32.xlu0 %v2150_v28 }
 0xdd5   :  { %2154 = vadd.xlane.f32.xlu1 %v2153_v58 }
 0xdd7   :  { %2157 = vadd.xlane.f32.xlu0 %v2156_v63 }
 0xe4e   :  { %v2137_v30 = vpop.xlane.xlu1 %2136 }
 0xe4f   :  { %v2159_v47 = vmul.f32 0.03125, %v2137_v30 }
 0xe50   :  { %v2140_v33 = vpop.xlane.xlu0 %2139 }
 0xe51   :  { %v3780_v6 = vsub.f32 %v2123_v49, %v2159_v47  ;;  %v2160_v42 = vmul.f32 0.03125, %v2140_v33  ;;  %v2975_v49 = vmov 0.0  }
 0xe52   :  { %v2143_v34 = vpop.xlane.xlu1 %2142  ;;  %2740 = vmatprep.subr.bf16.mxu0 %v2975_v49  ;;  %2752 = vmatprep.subr.bf16.mxu1 %v2975_v49 }
 0xe53   :  { %v3782_v48 = vsub.f32 %v2124_v55, %v2160_v42  ;;  %v2161_v12 = vmul.f32 0.03125, %v2143_v34  ;;  %v2175_v52 = vmul.f32 %v3780_v6, %v3780_v6  ;;  %2748 = vmatprep.mubr.msk.bf16.mxu0 %vm2976_vm2, %v2975_v49  ;;  %2756 = vmatprep.mubr.msk.bf16.mxu1 %vm2976_vm2, %v2975_v49  ;;  %v2788_v55 = vld [vmem:[%s3871_s3 + $0x8] sm:$0xff]   ;;  %v2510_v42 = vld [vmem:[%s3884_s16 + $0x1] ss:$0 sm:$0xff] }
 0xe54   :  { %v2146_v9 = vpop.xlane.xlu0 %2145  ;;  %2753 = vmatpush3.bf16.msra.mxu1 %v2787_v18 }
 0xe55   :  { %v3786_v45 = vsub.f32 %v2125_v46, %v2161_v12  ;;  %v2162_v25 = vmul.f32 0.03125, %v2146_v9  ;;  %v2183_v14 = vsel %vm97_vm0, %v2175_v52, 0.0  ;;  %v2176_v29 = vmul.f32 %v3782_v48, %v3782_v48  ;;  %2754 = vmatprep.subr.bf16.mxu1 %v2975_v49 }
 0xe56   :  { %2184 = vadd.xlane.f32.xlu1 %v2183_v14 }
 0xe57   :  { %v3791_v15 = vsub.f32 %v2126_v2, %v2162_v25  ;;  %v2186_v13 = vsel %vm97_vm0, %v2176_v29, 0.0  ;;  %v2177_v32 = vmul.f32 %v3786_v45, %v3786_v45 }
 0xe58   :  { %2187 = vadd.xlane.f32.xlu0 %v2186_v13  ;;  %2755 = vmatpush3.bf16.msra.mxu1 %v2788_v55 }
 0xe59   :  { %v2189_v8 = vsel %vm97_vm0, %v2177_v32, 0.0  ;;  %v2178_v40 = vmul.f32 %v3791_v15, %v3791_v15 }
 0xe5a   :  { %2190 = vadd.xlane.f32.xlu1 %v2189_v8 }
 0xe5b   :  { %v2192_v36 = vsel %vm97_vm0, %v2178_v40, 0.0 }
 0xe5c   :  { %2193 = vadd.xlane.f32.xlu0 %v2192_v36 }
 0xe5e   :  { %v2149_v7 = vpop.xlane.xlu1 %2148 }
 0xe5f   :  { %v2163_v61 = vmul.f32 0.03125, %v2149_v7 }
 0xe60   :  { %v2152_v23 = vpop.xlane.xlu0 %2151 }
 0xe61   :  { %v3800_v54 = vsub.f32 %v2127_v19, %v2163_v61  ;;  %v2164_v21 = vmul.f32 0.03125, %v2152_v23  ;;  %v2509_v19 = vld [vmem:[%s3883_s15 + $0x1] ss:$0 sm:$0xff] }
 0xe62   :  { %v2155_v37 = vpop.xlane.xlu1 %2154 }
 0xe63   :  { %v3802_v39 = vsub.f32 %v2128_v1, %v2164_v21  ;;  %v2165_v50 = vmul.f32 0.03125, %v2155_v37  ;;  %v2179_v43 = vmul.f32 %v3800_v54, %v3800_v54 }
 0xe64   :  { %v2158_v31 = vpop.xlane.xlu0 %2157 }
 0xe65   :  { %v3806_v38 = vsub.f32 %v2129_v10, %v2165_v50  ;;  %v2166_v11 = vmul.f32 0.03125, %v2158_v31  ;;  %v2195_v20 = vsel %vm97_vm0, %v2179_v43, 0.0  ;;  %v2180_v24 = vmul.f32 %v3802_v39, %v3802_v39 }
 0xe66   :  { %2196 = vadd.xlane.f32.xlu1 %v2195_v20 }
 0xe67   :  { %v3811_v57 = vsub.f32 %v2130_v5, %v2166_v11  ;;  %v2198_v26 = vsel %vm97_vm0, %v2180_v24, 0.0  ;;  %v2181_v51 = vmul.f32 %v3806_v38, %v3806_v38 }
 0xe68   :  { %2199 = vadd.xlane.f32.xlu0 %v2198_v26 }
 0xe69   :  { %v2201_v4 = vsel %vm97_vm0, %v2181_v51, 0.0  ;;  %v2182_v41 = vmul.f32 %v3811_v57, %v3811_v57 }
 0xe6a   :  { %2202 = vadd.xlane.f32.xlu1 %v2201_v4 }
 0xe6b   :  { %v2204_v0 = vsel %vm97_vm0, %v2182_v41, 0.0 }
 0xe6c   :  { %2205 = vadd.xlane.f32.xlu0 %v2204_v0 }
 0xee3   :  { %v2185_v46 = vpop.xlane.xlu1 %2184 }
 0xee4   :  { %v2207_v35 = vmul.f32 0.03125, %v2185_v46 }
 0xee5   :  { %v2188_v2 = vpop.xlane.xlu0 %2187 }
 0xee6   :  { %v2215_v44 = vadd.f32 1e-06, %v2207_v35  ;;  %v2208_v17 = vmul.f32 0.03125, %v2188_v2 }
 0xee7   :  { %v2191_v22 = vpop.xlane.xlu1 %2190 }
 0xee8   :  { %2933 = vrsqrt.f32 %v2215_v44  ;;  %v2216_v53 = vadd.f32 1e-06, %v2208_v17  ;;  %v2209_v16 = vmul.f32 0.03125, %v2191_v22  ;;  %v2512_v22 = vld [vmem:[%s3872_s4] ss:$0 sm:$0xff] }
 0xee9   :  { %v2194_v59 = vpop.xlane.xlu0 %2193 }
 0xeea   :  { %2935 = vrsqrt.f32 %v2216_v53  ;;  %v2217_v62 = vadd.f32 1e-06, %v2209_v16  ;;  %v2210_v60 = vmul.f32 0.03125, %v2194_v59 }
 0xeec   :  { %2937 = vrsqrt.f32 %v2217_v62  ;;  %v2218_v3 = vadd.f32 1e-06, %v2210_v60 }
 0xeee   :  { %2939 = vrsqrt.f32 %v2218_v3 }
 0xef2   :  { %v2934_v27 = vpop.eup %2933 }
 0xef3   :  { %v2231_v56 = vmul.f32 %v2934_v27, %v3780_v6  ;;  %v2197_v1 = vpop.xlane.xlu1 %2196 }
 0xef4   :  { %v2936_v10 = vpop.eup %2935  ;;  %v2211_v28 = vmul.f32 0.03125, %v2197_v1 }
 0xef5   :  { %v2232_v5 = vmul.f32 %v2936_v10, %v3782_v48  ;;  %v2200_v58 = vpop.xlane.xlu0 %2199  ;;  %v2245_v63 = vmul.f32 %v2509_v19, %v2231_v56 }
 0xef6   :  { %v2938_v30 = vpop.eup %2937  ;;  %v2219_v47 = vadd.f32 1e-06, %v2211_v28  ;;  %v2212_v33 = vmul.f32 0.03125, %v2200_v58 }
 0xef7   :  { %v2233_v34 = vmul.f32 %v2938_v30, %v3786_v45  ;;  %v2203_v12 = vpop.xlane.xlu1 %2202  ;;  %v2246_v52 = vmul.f32 %v2509_v19, %v2232_v5  ;;  %v2259_v29 = vadd.f32 %v2510_v42, %v2245_v63 }
 0xef8   :  { %v2940_v9 = vpop.eup %2939  ;;  %2941 = vrsqrt.f32 %v2219_v47  ;;  %v2220_v6 = vadd.f32 1e-06, %v2212_v33  ;;  %v2213_v25 = vmul.f32 0.03125, %v2203_v12 }
 0xef9   :  { %v2234_v14 = vmul.f32 %v2940_v9, %v3791_v15  ;;  %v2206_v48 = vpop.xlane.xlu0 %2205  ;;  %v2260_v13 = vadd.f32 %v2510_v42, %v2246_v52  ;;  %v2247_v32 = vmul.f32 %v2509_v19, %v2233_v34 }
 0xefa   :  { %2943 = vrsqrt.f32 %v2220_v6  ;;  %v2221_v8 = vadd.f32 1e-06, %v2213_v25  ;;  %v2214_v40 = vmul.f32 0.03125, %v2206_v48 }
 0xefb   :  { %v2268_v36 = vpack.c.bf16 %v2260_v13, %v2259_v29  ;;  %v2248_v7 = vmul.f32 %v2509_v19, %v2234_v14  ;;  %v2261_v45 = vadd.f32 %v2510_v42, %v2247_v32 }
 0xefc   :  { %2945 = vrsqrt.f32 %v2221_v8  ;;  %v2222_v61 = vadd.f32 1e-06, %v2214_v40 }
 0xefd   :  { %2741 = vmatpush3.bf16.msra.mxu0 %v2268_v36  ;;  %v2262_v23 = vadd.f32 %v2510_v42, %v2248_v7 }
 0xefe   :  { %2947 = vrsqrt.f32 %v2222_v61  ;;  %2742 = vmatprep.subr.bf16.mxu0 %v2975_v49 }
 0xeff   :  { %v2269_v21 = vpack.c.bf16 %v2262_v23, %v2261_v45 }
 0xf01   :  { %2743 = vmatpush3.bf16.msra.mxu0 %v2269_v21 }
 0xf02   :  { %v2942_v15 = vpop.eup %2941  ;;  %2744 = vmatprep.subr.bf16.mxu0 %v2975_v49 }
 0xf03   :  { %v2235_v37 = vmul.f32 %v2942_v15, %v3800_v54 }
 0xf04   :  { %v2944_v50 = vpop.eup %2943 }
 0xf05   :  { %v2236_v43 = vmul.f32 %v2944_v50, %v3802_v39  ;;  %v2249_v31 = vmul.f32 %v2509_v19, %v2235_v37  ;;  %v2267_v39 = vld [vmem:[%s3870_s2] sm:$0x1]  ;;  %s2949_s2 = scalar_lea.vmem %s2390_s26, 32 }
 0xf06   :  { %v2946_v11 = vpop.eup %2945  ;;  %p2950_p0 = scmp.ne.s32.totalorder %s2390_s26, %s2949_s2  ;;  %p2955_p2 = scmp.lt.s32.totalorder %s2949_s2, %s2949_s2 }
 0xf07   :  { %v2237_v20 = vmul.f32 %v2946_v11, %v3806_v38  ;;  %v2250_v24 = vmul.f32 %v2509_v19, %v2236_v43  ;;  %v2263_v4 = vadd.f32 %v2510_v42, %v2249_v31 }
 0xf08   :  { %v2948_v26 = vpop.eup %2947  ;;  %p2956_p3 = por %p2955_p2, %p2954_p1 }
 0xf09   :  { %v2238_v51 = vmul.f32 %v2948_v26, %v3811_v57  ;;  %v2264_v41 = vadd.f32 %v2510_v42, %v2250_v24  ;;  %v2251_v0 = vmul.f32 %v2509_v19, %v2237_v20 }
 0xf0a   :  { %p2957_p4 = pnand %p2956_p3, %p2950_p0 }
 0xf0b   :  { %v2270_v18 = vpack.c.bf16 %v2264_v41, %v2263_v4  ;;  %v2252_v55 = vmul.f32 %v2509_v19, %v2238_v51  ;;  %v2265_v46 = vadd.f32 %v2510_v42, %v2251_v0 }
 0xf0d   :  { %2745 = vmatpush3.bf16.msra.mxu0 %v2270_v18  ;;  %v2266_v35 = vadd.f32 %v2510_v42, %v2252_v55 }
 0xf0e   :  { %2746 = vmatprep.subr.bf16.mxu0 %v2975_v49 }
 0xf0f   :  { %v2271_v54 = vpack.c.bf16 %v2266_v35, %v2265_v46 }
 0xf11   :  { %2747 = vmatpush3.bf16.msra.mxu0 %v2271_v54 }
 0xf14   :  { %2749 = vmatmul.mubr.msk.bf16.vlgmr.msra.gmra.mrb[48].mxu0 %vm950_vm1, %v2267_v39 }
 0xfe7   :  { %v2309_v38 = vpop.f32.mrb[48].mxu0 }
 0xfe8   :  { %v2315_v57 = vpack.c.bf16 %v2309_v38, %v2309_v38  ;;  %v2750_v2 = vpop.f32.mrb[49].mxu0 }
 0xfe9   :  { %v2312_v44 = vpop.f32.mrb[50].mxu0 }
 0xfea   :  { %v2751_v17 = vpop.f32.mrb[51].mxu0  ;;  %2757 = vmatmul.mubr.msk.bf16.vlgmr.msra.gmra.mrb[48].mxu1 %vm97_vm0, %v2315_v57 }
0x10bd   :  { %v2376_v49 = vpop.f32.mrb[48].mxu1 }
0x10be   :  { %v2377_v53 = vadd.f32 %v2512_v22, %v2376_v49  ;;  %v2758_v16 = vpop.f32.mrb[49].mxu1 }
0x10bf   :  { %v2379_v59 = vpop.f32.mrb[50].mxu1 }
0x10c0   :  { %2382 = vst [vmem:[#allocation2] sm:$0x3] %v2377_v53  ;;  %v2759_v62 = vpop.f32.mrb[51].mxu1 }
0x10c1   :  { %2960 = shalt.err (!%p2957_p4)
}
0x10c2   :  { %s2961_s4 = scalar_lea.hbm %s3885_s17, 32 }
0x10c3   :  { %p2962_p5 = scmp.ne.s32.totalorder %s3885_s17, %s2961_s4  ;;  %p2965_p6 = scmp.lt.u32.totalorder %s2961_s4, %s3885_s17 }
0x10c5   :  { %p2967_p7 = pnand %p2965_p6, %p2962_p5 }
0x10c7   :  { %2970 = shalt.err (!%p2967_p7)
}
0x10c8   :  { %2392 = dma.vmem_to_hbm [thread:$0]  %s2390_s26, 32, %s3885_s17, [#allocation3]  }
0x10c9   :  { %2971 = dma.done.wait [#allocation3], 32  }
0x10ca   :  { %2972 = vsyncadd [#allocation3], 4294967264 }
0x10cb   :  { %2396 = vsyncpa [#allocation3], 1 }

</bundles_post_ra>
